<compile_context>
chip_gen: v7x
topology: tpu7x:2x2x1
jax: 0.10.0
libtpu: 0.0.40
codegen_flags: <defaults>
</compile_context>

<pallas_src>
import functools

import jax
import jax.numpy as jnp
from jax import lax
from jax.experimental import pallas as pl
from jax.experimental.pallas import tpu as pltpu


def _fused_kernel(x_ref, w1_ref, b1_ref, a1_ref, w2_ref, b2_ref, a2_ref,
                  w3_ref, b3_ref, o_ref, xpad_ref, vpad_ref, *, H, W, C):
    """Fused conv1+PReLU -> (folded shuffle) conv2+PReLU -> conv3+ReLU.

    Layouts (all f32, spatial flattened on the lane axis):
      x_ref   : (1, Cin, H*W)       input image (channel-major, row-major flat)
      w1_ref  : (4*C, 9*Cin)        conv1 weights, rows phase-major (k*C + c)
      b1_ref  : (4*C, 1)            conv1 bias  (phase-major)
      a1_ref  : (4*C, 1)            PReLU slope expanded over sub-phases
      w2_ref  : (C//2, 9*C)         conv2 weights (tap-major columns)
      b2_ref, a2_ref : (C//2, 1)
      w3_ref  : (C, C//2)           1x1 conv
      b3_ref  : (C, 1)
      o_ref   : (1, 4, C, H*W)      output, phase-separated (phase = 2*py+px)
      xpad_ref: (Cin, H*W + 2W + 2) zero-padded flat input scratch
      vpad_ref: (4*C, H*W + 2W + 2) zero-padded flat conv1-activation scratch
    """
    HW = H * W
    Cin = x_ref.shape[1]
    OFF = W + 1  # data offset inside the flat padded buffers

    # Column masks: kill the horizontal wrap-around introduced by the flat
    # (row-major) padding trick.  Vertical out-of-range taps land in the
    # zero pad rows automatically.
    col = lax.broadcasted_iota(jnp.int32, (1, HW), 1) % W
    mask_l = (col != 0).astype(jnp.float32)        # for horizontal shift -1
    mask_r = (col != W - 1).astype(jnp.float32)    # for horizontal shift +1

    def shifted_slice(pad_ref, row_lo, row_hi, dy, dx):
        # Reads pad[rows, p + dy*W + dx] for every flat pixel p, masked so it
        # equals img[rows, y+dy, x+dx] with zero padding outside the image.
        s = OFF + dy * W + dx
        v = pad_ref[row_lo:row_hi, s:s + HW]
        if dx == -1:
            v = v * mask_l
        elif dx == 1:
            v = v * mask_r
        return v

    # ----------------- conv1 (3x3) + bias + PReLU -----------------
    xpad_ref[...] = jnp.zeros_like(xpad_ref)
    xpad_ref[:, OFF:OFF + HW] = x_ref[0]

    cols1 = []
    for dy in (-1, 0, 1):
        for dx in (-1, 0, 1):
            cols1.append(shifted_slice(xpad_ref, 0, Cin, dy, dx))
    im2col1 = jnp.concatenate(cols1, axis=0)                    # (9*Cin, HW)

    v = jnp.dot(w1_ref[...], im2col1,
                preferred_element_type=jnp.float32)             # (4C, HW)
    v = v + b1_ref[...]
    v = jnp.where(v > 0, v, v * a1_ref[...])                    # fused PReLU

    # Stash the (phase-major) conv1 activation in a padded flat scratch so
    # conv2's phase-folded taps are plain shifted slices of it.
    vpad_ref[...] = jnp.zeros_like(vpad_ref)
    vpad_ref[:, OFF:OFF + HW] = v

    # ------- conv2 (3x3 on the shuffled image, phase-folded) + PReLU -------
    # ------- conv3 (1x1) + bias + ReLU, per high-res phase           -------
    for py in (0, 1):
        for px in (0, 1):
            cols2 = []
            for dy in (-1, 0, 1):
                ay, ry = divmod(py + dy, 2)
                for dx in (-1, 0, 1):
                    ax, rx = divmod(px + dx, 2)
                    k = 2 * ry + rx                              # sub-phase
                    cols2.append(
                        shifted_slice(vpad_ref, k * C, (k + 1) * C, ay, ax))
            im2col2 = jnp.concatenate(cols2, axis=0)             # (9*C, HW)

            h = jnp.dot(w2_ref[...], im2col2,
                        preferred_element_type=jnp.float32)      # (C//2, HW)
            h = h + b2_ref[...]
            h = jnp.where(h > 0, h, h * a2_ref[...])             # PReLU

            out = jnp.dot(w3_ref[...], h,
                          preferred_element_type=jnp.float32)    # (C, HW)
            out = jnp.maximum(out + b3_ref[...], 0.0)            # ReLU
            o_ref[0, 2 * py + px] = out.astype(o_ref.dtype)


def upscale_net_old(x_nchw, params, out_CH):
    """Forward pass. Input NCHW, output NCHW (N, out_CH, 2H, 2W)."""
    N, Cin, H, W = x_nchw.shape
    HW = H * W
    C = out_CH
    C4 = 4 * C
    Ch = C // 2
    L = HW + 2 * W + 2

    # --- parameter packing (pure XLA, constant-folded under jit) ---
    # conv1 output channels reordered phase-major: new row k*C + c holds the
    # original output channel c*4 + k (PyTorch PixelShuffle ordering).
    perm = (jnp.arange(C)[None, :] * 4 + jnp.arange(4)[:, None]).reshape(-1)
    w1m = jnp.transpose(params["w1"], (3, 0, 1, 2)).reshape(C4, 9 * Cin)[perm]
    b1m = params["b1"][perm].reshape(C4, 1)
    a1m = jnp.tile(params["a1"], 4).reshape(C4, 1)   # PReLU(out_CH), expanded
    w2m = jnp.transpose(params["w2"], (3, 0, 1, 2)).reshape(Ch, 9 * C)
    b2m = params["b2"].reshape(Ch, 1)
    a2m = params["a2"].reshape(Ch, 1)
    w3m = params["w3"].reshape(Ch, C).T              # (C, C//2)
    b3m = params["b3"].reshape(C, 1)

    x2d = x_nchw.reshape(N, Cin, HW)                 # free reshape, stays NCHW

    kernel = functools.partial(_fused_kernel, H=H, W=W, C=C)
    out = pl.pallas_call(
        kernel,
        out_shape=jax.ShapeDtypeStruct((N, 4, C, HW), jnp.float32),
        grid_spec=pltpu.PrefetchScalarGridSpec(
            num_scalar_prefetch=0,
            grid=(N,),
            in_specs=[
                pl.BlockSpec((1, Cin, HW), lambda n: (n, 0, 0)),
                pl.BlockSpec((C4, 9 * Cin), lambda n: (0, 0)),
                pl.BlockSpec((C4, 1), lambda n: (0, 0)),
                pl.BlockSpec((C4, 1), lambda n: (0, 0)),
                pl.BlockSpec((Ch, 9 * C), lambda n: (0, 0)),
                pl.BlockSpec((Ch, 1), lambda n: (0, 0)),
                pl.BlockSpec((Ch, 1), lambda n: (0, 0)),
                pl.BlockSpec((C, Ch), lambda n: (0, 0)),
                pl.BlockSpec((C, 1), lambda n: (0, 0)),
            ],
            out_specs=pl.BlockSpec((1, 4, C, HW), lambda n: (n, 0, 0, 0)),
            scratch_shapes=[
                pltpu.VMEM((Cin, L), jnp.float32),
                pltpu.VMEM((C4, L), jnp.float32),
            ],
        ),
        compiler_params=pltpu.CompilerParams(
            dimension_semantics=("parallel",)),
    )(x2d, w1m, b1m, a1m, w2m, b2m, a2m, w3m, b3m)

    # Final depth-to-space on the kernel output (pure layout glue in XLA):
    # out[n, 2*py+px, d, y*W+x] -> y_final[n, d, 2y+py, 2x+px]
    out = out.reshape(N, 2, 2, C, H, W)
    out = out.transpose(0, 3, 4, 1, 5, 2)
    return out.reshape(N, C, 2 * H, 2 * W)


# ---------------------------------------------------------------------------
# Deterministic synthetic parameters (HWIO weights, per-channel biases)
# ---------------------------------------------------------------------------
def init_params(key, in_CH, out_CH):
    ks = jax.random.split(key, 6)

    def winit(k, kh, kw, cin, cout):
        fan_in = cin * kh * kw
        return jax.random.normal(k, (kh, kw, cin, cout), jnp.float32) / jnp.sqrt(
            jnp.float32(fan_in))

    p = {}
    p["w1"] = winit(ks[0], 3, 3, in_CH, out_CH * 4)
    p["b1"] = 0.01 * jax.random.normal(ks[1], (out_CH * 4,), jnp.float32)
    p["a1"] = jnp.full((out_CH,), 0.25, jnp.float32)          # PReLU(out_CH)
    p["w2"] = winit(ks[2], 3, 3, out_CH, out_CH // 2)
    p["b2"] = 0.01 * jax.random.normal(ks[3], (out_CH // 2,), jnp.float32)
    p["a2"] = jnp.full((out_CH // 2,), 0.25, jnp.float32)      # PReLU(out_CH//2)
    p["w3"] = winit(ks[4], 1, 1, out_CH // 2, out_CH)
    p["b3"] = 0.01 * jax.random.normal(ks[5], (out_CH,), jnp.float32)
    return p


# ---------------------------------------------------------------------------
# Pure-JAX reference (for correctness check)
# ---------------------------------------------------------------------------
def _ref_conv(x_nhwc, w_hwio, bias, pad):
    y = lax.conv_general_dilated(
        x_nhwc, w_hwio, window_strides=(1, 1),
        padding=((pad, pad), (pad, pad)),
        dimension_numbers=("NHWC", "HWIO", "NHWC"))
    return y + bias


def _pixel_shuffle_nhwc(x, r):
    N, H, W, Crr = x.shape
    C = Crr // (r * r)
    x = x.reshape(N, H, W, C, r, r)
    x = x.transpose(0, 1, 4, 2, 5, 3)
    return x.reshape(N, H * r, W * r, C)


def _prelu(x, a):
    return jnp.where(x > 0, x, x * a)


def upscale_net_old_ref(x_nchw, params):
    x = jnp.transpose(x_nchw, (0, 2, 3, 1))
    y = _ref_conv(x, params["w1"], params["b1"], 1)
    y = _pixel_shuffle_nhwc(y, 2)
    y = _prelu(y, params["a1"])
    y = _ref_conv(y, params["w2"], params["b2"], 1)
    y = _prelu(y, params["a2"])
    y = _ref_conv(y, params["w3"], params["b3"], 0)
    y = jnp.maximum(y, 0.0)
    return jnp.transpose(y, (0, 3, 1, 2))


if __name__ == "__main__":
    N, in_CH, out_CH, H, W = 2, 4, 8, 16, 16

    key = jax.random.PRNGKey(0)
    k_x, k_p = jax.random.split(key)
    x = jax.random.normal(k_x, (N, in_CH, H, W), jnp.float32)   # NCHW input
    params = init_params(k_p, in_CH, out_CH)

    fwd = jax.jit(lambda xx: upscale_net_old(xx, params, out_CH))
    out = jax.block_until_ready(fwd(x))

    ref = upscale_net_old_ref(x, params)
    assert out.shape == (N, out_CH, 2 * H, 2 * W), out.shape
    assert jnp.allclose(out, ref, atol=1e-4, rtol=1e-4), (
        float(jnp.max(jnp.abs(out - ref))))

    print("KERNEL_OK")
</pallas_src>

<mosaic_0001>
module attributes {stable_mosaic.version = 11 : i64} {
  func.func @_fused_kernel(%arg0: i32, %arg1: memref<1x4x256xf32, #tpu.memory_space<vmem>>, %arg2: memref<32x36xf32, #tpu.memory_space<vmem>>, %arg3: memref<32x1xf32, #tpu.memory_space<vmem>>, %arg4: memref<32x1xf32, #tpu.memory_space<vmem>>, %arg5: memref<4x72xf32, #tpu.memory_space<vmem>>, %arg6: memref<4x1xf32, #tpu.memory_space<vmem>>, %arg7: memref<4x1xf32, #tpu.memory_space<vmem>>, %arg8: memref<8x4xf32, #tpu.memory_space<vmem>>, %arg9: memref<8x1xf32, #tpu.memory_space<vmem>>, %arg10: memref<1x4x8x256xf32, #tpu.memory_space<vmem>>, %arg11: memref<4x290xf32, #tpu.memory_space<vmem>>, %arg12: memref<32x290xf32, #tpu.memory_space<vmem>>) attributes {dimension_semantics = [#tpu.dimension_semantics<parallel>], iteration_bounds = array<i64: 2>, scalar_prefetch = 0 : i64, scratch_operands = 2 : i64, tpu.core_type = #tpu.core_type<tc>, window_params = [{transform_indices = @transform_0, window_bounds = array<i64: 1, 4, 256>}, {pipeline_mode = #tpu.pipeline_mode<synchronous>, transform_indices = @transform_1, window_bounds = array<i64: 32, 36>}, {pipeline_mode = #tpu.pipeline_mode<synchronous>, transform_indices = @transform_2, window_bounds = array<i64: 32, 1>}, {pipeline_mode = #tpu.pipeline_mode<synchronous>, transform_indices = @transform_3, window_bounds = array<i64: 32, 1>}, {pipeline_mode = #tpu.pipeline_mode<synchronous>, transform_indices = @transform_4, window_bounds = array<i64: 4, 72>}, {pipeline_mode = #tpu.pipeline_mode<synchronous>, transform_indices = @transform_5, window_bounds = array<i64: 4, 1>}, {pipeline_mode = #tpu.pipeline_mode<synchronous>, transform_indices = @transform_6, window_bounds = array<i64: 4, 1>}, {pipeline_mode = #tpu.pipeline_mode<synchronous>, transform_indices = @transform_7, window_bounds = array<i64: 8, 4>}, {pipeline_mode = #tpu.pipeline_mode<synchronous>, transform_indices = @transform_8, window_bounds = array<i64: 8, 1>}, {transform_indices = @transform_9, window_bounds = array<i64: 1, 4, 8, 256>}]} {
    %0 = tpu.iota {dimensions = array<i32: 1>} : vector<1x256xi32>
    %c16_i32 = arith.constant 16 : i32
    %c0_i32 = arith.constant 0 : i32
    %1 = arith.cmpi eq, %c16_i32, %c0_i32 : i32
    %c1_i32 = arith.constant 1 : i32
    %2 = arith.select %1, %c1_i32, %c16_i32 : i32
    %3 = vector.broadcast %2 : i32 to vector<1x256xi32>
    %4 = arith.remsi %0, %3 : vector<1x256xi32>
    %c0_i32_0 = arith.constant 0 : i32
    %5 = vector.broadcast %c0_i32_0 : i32 to vector<1x256xi32>
    %6 = arith.cmpi ne, %4, %5 : vector<1x256xi32>
    %c0_i32_1 = arith.constant 0 : i32
    %7 = vector.broadcast %c0_i32_1 : i32 to vector<1x256xi32>
    %8 = arith.cmpi slt, %4, %7 : vector<1x256xi32>
    %c0_i32_2 = arith.constant 0 : i32
    %9 = arith.cmpi slt, %2, %c0_i32_2 : i32
    %10 = vector.broadcast %9 : i1 to vector<1x256xi1>
    %11 = vector.broadcast %10 : vector<1x256xi1> to vector<1x256xi1>
    %12 = arith.xori %8, %11 : vector<1x256xi1>
    %13 = arith.andi %12, %6 : vector<1x256xi1>
    %14 = vector.broadcast %2 : i32 to vector<1x256xi32>
    %15 = arith.addi %4, %14 : vector<1x256xi32>
    %16 = arith.select %13, %15, %4 : vector<1x256xi1>, vector<1x256xi32>
    %c0_i32_3 = arith.constant 0 : i32
    %17 = vector.broadcast %c0_i32_3 : i32 to vector<1x256xi32>
    %18 = arith.cmpi ne, %16, %17 : vector<1x256xi32>
    %19 = arith.extui %18 : vector<1x256xi1> to vector<1x256xi32>
    %20 = arith.sitofp %19 : vector<1x256xi32> to vector<1x256xf32>
    %c15_i32 = arith.constant 15 : i32
    %21 = vector.broadcast %c15_i32 : i32 to vector<1x256xi32>
    %22 = arith.cmpi ne, %16, %21 : vector<1x256xi32>
    %23 = arith.extui %22 : vector<1x256xi1> to vector<1x256xi32>
    %24 = arith.sitofp %23 : vector<1x256xi32> to vector<1x256xf32>
    %cst = arith.constant 0.000000e+00 : f32
    %25 = vector.broadcast %cst : f32 to vector<4x290xf32>
    %c0 = arith.constant 0 : index
    %c0_4 = arith.constant 0 : index
    %26 = vector.load %arg11[%c0, %c0_4] : memref<4x290xf32, #tpu.memory_space<vmem>>, vector<4x290xf32>
    tpu.vector_store %arg11[%c0, %c0_4], %25 {strides = array<i32>} : memref<4x290xf32, #tpu.memory_space<vmem>>, vector<4x290xf32>,
    %c0_5 = arith.constant 0 : index
    %c0_6 = arith.constant 0 : index
    %c0_7 = arith.constant 0 : index
    %27 = vector.load %arg1[%c0_5, %c0_6, %c0_7] : memref<1x4x256xf32, #tpu.memory_space<vmem>>, vector<1x4x256xf32>
    %28 = vector.shape_cast %27 : vector<1x4x256xf32> to vector<4x256xf32>
    %c0_8 = arith.constant 0 : index
    %c17 = arith.constant 17 : index
    %29 = vector.load %arg11[%c0_8, %c17] : memref<4x290xf32, #tpu.memory_space<vmem>>, vector<4x256xf32>
    tpu.vector_store %arg11[%c0_8, %c17], %28 {strides = array<i32>} : memref<4x290xf32, #tpu.memory_space<vmem>>, vector<4x256xf32>,
    %c0_9 = arith.constant 0 : index
    %c0_10 = arith.constant 0 : index
    %30 = vector.load %arg11[%c0_9, %c0_10] : memref<4x290xf32, #tpu.memory_space<vmem>>, vector<4x256xf32>
    %31 = vector.broadcast %20 : vector<1x256xf32> to vector<4x256xf32>
    %32 = arith.mulf %30, %31 : vector<4x256xf32>
    %c0_11 = arith.constant 0 : index
    %c1 = arith.constant 1 : index
    %33 = vector.load %arg11[%c0_11, %c1] : memref<4x290xf32, #tpu.memory_space<vmem>>, vector<4x256xf32>
    %c0_12 = arith.constant 0 : index
    %c2 = arith.constant 2 : index
    %34 = vector.load %arg11[%c0_12, %c2] : memref<4x290xf32, #tpu.memory_space<vmem>>, vector<4x256xf32>
    %35 = vector.broadcast %24 : vector<1x256xf32> to vector<4x256xf32>
    %36 = arith.mulf %34, %35 : vector<4x256xf32>
    %c0_13 = arith.constant 0 : index
    %c16 = arith.constant 16 : index
    %37 = vector.load %arg11[%c0_13, %c16] : memref<4x290xf32, #tpu.memory_space<vmem>>, vector<4x256xf32>
    %38 = vector.broadcast %20 : vector<1x256xf32> to vector<4x256xf32>
    %39 = arith.mulf %37, %38 : vector<4x256xf32>
    %c0_14 = arith.constant 0 : index
    %c17_15 = arith.constant 17 : index
    %40 = vector.load %arg11[%c0_14, %c17_15] : memref<4x290xf32, #tpu.memory_space<vmem>>, vector<4x256xf32>
    %c0_16 = arith.constant 0 : index
    %c18 = arith.constant 18 : index
    %41 = vector.load %arg11[%c0_16, %c18] : memref<4x290xf32, #tpu.memory_space<vmem>>, vector<4x256xf32>
    %42 = vector.broadcast %24 : vector<1x256xf32> to vector<4x256xf32>
    %43 = arith.mulf %41, %42 : vector<4x256xf32>
    %c0_17 = arith.constant 0 : index
    %c32 = arith.constant 32 : index
    %44 = vector.load %arg11[%c0_17, %c32] : memref<4x290xf32, #tpu.memory_space<vmem>>, vector<4x256xf32>
    %45 = vector.broadcast %20 : vector<1x256xf32> to vector<4x256xf32>
    %46 = arith.mulf %44, %45 : vector<4x256xf32>
    %c0_18 = arith.constant 0 : index
    %c33 = arith.constant 33 : index
    %47 = vector.load %arg11[%c0_18, %c33] : memref<4x290xf32, #tpu.memory_space<vmem>>, vector<4x256xf32>
    %c0_19 = arith.constant 0 : index
    %c34 = arith.constant 34 : index
    %48 = vector.load %arg11[%c0_19, %c34] : memref<4x290xf32, #tpu.memory_space<vmem>>, vector<4x256xf32>
    %49 = vector.broadcast %24 : vector<1x256xf32> to vector<4x256xf32>
    %50 = arith.mulf %48, %49 : vector<4x256xf32>
    %51 = tpu.concatenate %32, %33, %36, %39, %40, %43, %46, %47, %50 in 0 : vector<4x256xf32>, vector<4x256xf32>, vector<4x256xf32>, vector<4x256xf32>, vector<4x256xf32>, vector<4x256xf32>, vector<4x256xf32>, vector<4x256xf32>, vector<4x256xf32> -> vector<36x256xf32>
    %c0_20 = arith.constant 0 : index
    %c0_21 = arith.constant 0 : index
    %52 = vector.load %arg2[%c0_20, %c0_21] : memref<32x36xf32, #tpu.memory_space<vmem>>, vector<32x36xf32>
    %cst_22 = arith.constant dense<0.000000e+00> : vector<32x256xf32>
    %53 = tpu.matmul %52, %51, %cst_22 {dimension_numbers = #tpu.dot_dimension_numbers<[1], [0], [0], [1], [0, 0, 1, 1], [], []>} : vector<32x36xf32>, vector<36x256xf32>, vector<32x256xf32> -> vector<32x256xf32>
    %c0_23 = arith.constant 0 : index
    %c0_24 = arith.constant 0 : index
    %54 = vector.load %arg3[%c0_23, %c0_24] : memref<32x1xf32, #tpu.memory_space<vmem>>, vector<32x1xf32>
    %55 = vector.broadcast %54 : vector<32x1xf32> to vector<32x256xf32>
    %56 = arith.addf %53, %55 : vector<32x256xf32>
    %cst_25 = arith.constant 0.000000e+00 : f32
    %57 = vector.broadcast %cst_25 : f32 to vector<32x256xf32>
    %58 = arith.cmpf ogt, %56, %57 : vector<32x256xf32>
    %c0_26 = arith.constant 0 : index
    %c0_27 = arith.constant 0 : index
    %59 = vector.load %arg4[%c0_26, %c0_27] : memref<32x1xf32, #tpu.memory_space<vmem>>, vector<32x1xf32>
    %60 = vector.broadcast %59 : vector<32x1xf32> to vector<32x256xf32>
    %61 = arith.mulf %56, %60 : vector<32x256xf32>
    %62 = arith.select %58, %56, %61 : vector<32x256xi1>, vector<32x256xf32>
    %cst_28 = arith.constant 0.000000e+00 : f32
    %63 = vector.broadcast %cst_28 : f32 to vector<32x290xf32>
    %c0_29 = arith.constant 0 : index
    %c0_30 = arith.constant 0 : index
    %64 = vector.load %arg12[%c0_29, %c0_30] : memref<32x290xf32, #tpu.memory_space<vmem>>, vector<32x290xf32>
    tpu.vector_store %arg12[%c0_29, %c0_30], %63 {strides = array<i32>} : memref<32x290xf32, #tpu.memory_space<vmem>>, vector<32x290xf32>,
    %c0_31 = arith.constant 0 : index
    %c17_32 = arith.constant 17 : index
    %65 = vector.load %arg12[%c0_31, %c17_32] : memref<32x290xf32, #tpu.memory_space<vmem>>, vector<32x256xf32>
    tpu.vector_store %arg12[%c0_31, %c17_32], %62 {strides = array<i32>} : memref<32x290xf32, #tpu.memory_space<vmem>>, vector<32x256xf32>,
    %c24 = arith.constant 24 : index
    %c0_33 = arith.constant 0 : index
    %66 = vector.load %arg12[%c24, %c0_33] : memref<32x290xf32, #tpu.memory_space<vmem>>, vector<8x256xf32>
    %67 = vector.broadcast %20 : vector<1x256xf32> to vector<8x256xf32>
    %68 = arith.mulf %66, %67 : vector<8x256xf32>
    %c16_34 = arith.constant 16 : index
    %c1_35 = arith.constant 1 : index
    %69 = vector.load %arg12[%c16_34, %c1_35] : memref<32x290xf32, #tpu.memory_space<vmem>>, vector<8x256xf32>
    %c24_36 = arith.constant 24 : index
    %c1_37 = arith.constant 1 : index
    %70 = vector.load %arg12[%c24_36, %c1_37] : memref<32x290xf32, #tpu.memory_space<vmem>>, vector<8x256xf32>
    %c8 = arith.constant 8 : index
    %c16_38 = arith.constant 16 : index
    %71 = vector.load %arg12[%c8, %c16_38] : memref<32x290xf32, #tpu.memory_space<vmem>>, vector<8x256xf32>
    %72 = vector.broadcast %20 : vector<1x256xf32> to vector<8x256xf32>
    %73 = arith.mulf %71, %72 : vector<8x256xf32>
    %c0_39 = arith.constant 0 : index
    %c17_40 = arith.constant 17 : index
    %74 = vector.load %arg12[%c0_39, %c17_40] : memref<32x290xf32, #tpu.memory_space<vmem>>, vector<8x256xf32>
    %c8_41 = arith.constant 8 : index
    %c17_42 = arith.constant 17 : index
    %75 = vector.load %arg12[%c8_41, %c17_42] : memref<32x290xf32, #tpu.memory_space<vmem>>, vector<8x256xf32>
    %c24_43 = arith.constant 24 : index
    %c16_44 = arith.constant 16 : index
    %76 = vector.load %arg12[%c24_43, %c16_44] : memref<32x290xf32, #tpu.memory_space<vmem>>, vector<8x256xf32>
    %77 = vector.broadcast %20 : vector<1x256xf32> to vector<8x256xf32>
    %78 = arith.mulf %76, %77 : vector<8x256xf32>
    %c16_45 = arith.constant 16 : index
    %c17_46 = arith.constant 17 : index
    %79 = vector.load %arg12[%c16_45, %c17_46] : memref<32x290xf32, #tpu.memory_space<vmem>>, vector<8x256xf32>
    %c24_47 = arith.constant 24 : index
    %c17_48 = arith.constant 17 : index
    %80 = vector.load %arg12[%c24_47, %c17_48] : memref<32x290xf32, #tpu.memory_space<vmem>>, vector<8x256xf32>
    %81 = tpu.concatenate %68, %69, %70, %73, %74, %75, %78, %79, %80 in 0 : vector<8x256xf32>, vector<8x256xf32>, vector<8x256xf32>, vector<8x256xf32>, vector<8x256xf32>, vector<8x256xf32>, vector<8x256xf32>, vector<8x256xf32>, vector<8x256xf32> -> vector<72x256xf32>
    %c0_49 = arith.constant 0 : index
    %c0_50 = arith.constant 0 : index
    %82 = vector.load %arg5[%c0_49, %c0_50] : memref<4x72xf32, #tpu.memory_space<vmem>>, vector<4x72xf32>
    %cst_51 = arith.constant dense<0.000000e+00> : vector<4x256xf32>
    %83 = tpu.matmul %82, %81, %cst_51 {dimension_numbers = #tpu.dot_dimension_numbers<[1], [0], [0], [1], [0, 0, 1, 1], [], []>} : vector<4x72xf32>, vector<72x256xf32>, vector<4x256xf32> -> vector<4x256xf32>
    %c0_52 = arith.constant 0 : index
    %c0_53 = arith.constant 0 : index
    %84 = vector.load %arg6[%c0_52, %c0_53] : memref<4x1xf32, #tpu.memory_space<vmem>>, vector<4x1xf32>
    %85 = vector.broadcast %84 : vector<4x1xf32> to vector<4x256xf32>
    %86 = arith.addf %83, %85 : vector<4x256xf32>
    %cst_54 = arith.constant 0.000000e+00 : f32
    %87 = vector.broadcast %cst_54 : f32 to vector<4x256xf32>
    %88 = arith.cmpf ogt, %86, %87 : vector<4x256xf32>
    %c0_55 = arith.constant 0 : index
    %c0_56 = arith.constant 0 : index
    %89 = vector.load %arg7[%c0_55, %c0_56] : memref<4x1xf32, #tpu.memory_space<vmem>>, vector<4x1xf32>
    %90 = vector.broadcast %89 : vector<4x1xf32> to vector<4x256xf32>
    %91 = arith.mulf %86, %90 : vector<4x256xf32>
    %92 = arith.select %88, %86, %91 : vector<4x256xi1>, vector<4x256xf32>
    %c0_57 = arith.constant 0 : index
    %c0_58 = arith.constant 0 : index
    %93 = vector.load %arg8[%c0_57, %c0_58] : memref<8x4xf32, #tpu.memory_space<vmem>>, vector<8x4xf32>
    %cst_59 = arith.constant dense<0.000000e+00> : vector<8x256xf32>
    %94 = tpu.matmul %93, %92, %cst_59 {dimension_numbers = #tpu.dot_dimension_numbers<[1], [0], [0], [1], [0, 0, 1, 1], [], []>} : vector<8x4xf32>, vector<4x256xf32>, vector<8x256xf32> -> vector<8x256xf32>
    %c0_60 = arith.constant 0 : index
    %c0_61 = arith.constant 0 : index
    %95 = vector.load %arg9[%c0_60, %c0_61] : memref<8x1xf32, #tpu.memory_space<vmem>>, vector<8x1xf32>
    %96 = vector.broadcast %95 : vector<8x1xf32> to vector<8x256xf32>
    %97 = arith.addf %94, %96 : vector<8x256xf32>
    %cst_62 = arith.constant 0.000000e+00 : f32
    %98 = vector.broadcast %cst_62 : f32 to vector<8x256xf32>
    %99 = arith.maximumf %97, %98 : vector<8x256xf32>
    %c0_63 = arith.constant 0 : index
    %c0_64 = arith.constant 0 : index
    %c0_65 = arith.constant 0 : index
    %c0_66 = arith.constant 0 : index
    %100 = vector.load %arg10[%c0_63, %c0_64, %c0_65, %c0_66] : memref<1x4x8x256xf32, #tpu.memory_space<vmem>>, vector<1x1x8x256xf32>
    %101 = vector.shape_cast %100 : vector<1x1x8x256xf32> to vector<8x256xf32>
    %102 = vector.shape_cast %99 : vector<8x256xf32> to vector<1x1x8x256xf32>
    tpu.vector_store %arg10[%c0_63, %c0_64, %c0_65, %c0_66], %102 {strides = array<i32>} : memref<1x4x8x256xf32, #tpu.memory_space<vmem>>, vector<1x1x8x256xf32>,
    %c16_67 = arith.constant 16 : index
    %c1_68 = arith.constant 1 : index
    %103 = vector.load %arg12[%c16_67, %c1_68] : memref<32x290xf32, #tpu.memory_space<vmem>>, vector<8x256xf32>
    %c24_69 = arith.constant 24 : index
    %c1_70 = arith.constant 1 : index
    %104 = vector.load %arg12[%c24_69, %c1_70] : memref<32x290xf32, #tpu.memory_space<vmem>>, vector<8x256xf32>
    %c16_71 = arith.constant 16 : index
    %c2_72 = arith.constant 2 : index
    %105 = vector.load %arg12[%c16_71, %c2_72] : memref<32x290xf32, #tpu.memory_space<vmem>>, vector<8x256xf32>
    %106 = vector.broadcast %24 : vector<1x256xf32> to vector<8x256xf32>
    %107 = arith.mulf %105, %106 : vector<8x256xf32>
    %c0_73 = arith.constant 0 : index
    %c17_74 = arith.constant 17 : index
    %108 = vector.load %arg12[%c0_73, %c17_74] : memref<32x290xf32, #tpu.memory_space<vmem>>, vector<8x256xf32>
    %c8_75 = arith.constant 8 : index
    %c17_76 = arith.constant 17 : index
    %109 = vector.load %arg12[%c8_75, %c17_76] : memref<32x290xf32, #tpu.memory_space<vmem>>, vector<8x256xf32>
    %c0_77 = arith.constant 0 : index
    %c18_78 = arith.constant 18 : index
    %110 = vector.load %arg12[%c0_77, %c18_78] : memref<32x290xf32, #tpu.memory_space<vmem>>, vector<8x256xf32>
    %111 = vector.broadcast %24 : vector<1x256xf32> to vector<8x256xf32>
    %112 = arith.mulf %110, %111 : vector<8x256xf32>
    %c16_79 = arith.constant 16 : index
    %c17_80 = arith.constant 17 : index
    %113 = vector.load %arg12[%c16_79, %c17_80] : memref<32x290xf32, #tpu.memory_space<vmem>>, vector<8x256xf32>
    %c24_81 = arith.constant 24 : index
    %c17_82 = arith.constant 17 : index
    %114 = vector.load %arg12[%c24_81, %c17_82] : memref<32x290xf32, #tpu.memory_space<vmem>>, vector<8x256xf32>
    %c16_83 = arith.constant 16 : index
    %c18_84 = arith.constant 18 : index
    %115 = vector.load %arg12[%c16_83, %c18_84] : memref<32x290xf32, #tpu.memory_space<vmem>>, vector<8x256xf32>
    %116 = vector.broadcast %24 : vector<1x256xf32> to vector<8x256xf32>
    %117 = arith.mulf %115, %116 : vector<8x256xf32>
    %118 = tpu.concatenate %103, %104, %107, %108, %109, %112, %113, %114, %117 in 0 : vector<8x256xf32>, vector<8x256xf32>, vector<8x256xf32>, vector<8x256xf32>, vector<8x256xf32>, vector<8x256xf32>, vector<8x256xf32>, vector<8x256xf32>, vector<8x256xf32> -> vector<72x256xf32>
    %c0_85 = arith.constant 0 : index
    %c0_86 = arith.constant 0 : index
    %119 = vector.load %arg5[%c0_85, %c0_86] : memref<4x72xf32, #tpu.memory_space<vmem>>, vector<4x72xf32>
    %cst_87 = arith.constant dense<0.000000e+00> : vector<4x256xf32>
    %120 = tpu.matmul %119, %118, %cst_87 {dimension_numbers = #tpu.dot_dimension_numbers<[1], [0], [0], [1], [0, 0, 1, 1], [], []>} : vector<4x72xf32>, vector<72x256xf32>, vector<4x256xf32> -> vector<4x256xf32>
    %c0_88 = arith.constant 0 : index
    %c0_89 = arith.constant 0 : index
    %121 = vector.load %arg6[%c0_88, %c0_89] : memref<4x1xf32, #tpu.memory_space<vmem>>, vector<4x1xf32>
    %122 = vector.broadcast %121 : vector<4x1xf32> to vector<4x256xf32>
    %123 = arith.addf %120, %122 : vector<4x256xf32>
    %cst_90 = arith.constant 0.000000e+00 : f32
    %124 = vector.broadcast %cst_90 : f32 to vector<4x256xf32>
    %125 = arith.cmpf ogt, %123, %124 : vector<4x256xf32>
    %c0_91 = arith.constant 0 : index
    %c0_92 = arith.constant 0 : index
    %126 = vector.load %arg7[%c0_91, %c0_92] : memref<4x1xf32, #tpu.memory_space<vmem>>, vector<4x1xf32>
    %127 = vector.broadcast %126 : vector<4x1xf32> to vector<4x256xf32>
    %128 = arith.mulf %123, %127 : vector<4x256xf32>
    %129 = arith.select %125, %123, %128 : vector<4x256xi1>, vector<4x256xf32>
    %c0_93 = arith.constant 0 : index
    %c0_94 = arith.constant 0 : index
    %130 = vector.load %arg8[%c0_93, %c0_94] : memref<8x4xf32, #tpu.memory_space<vmem>>, vector<8x4xf32>
    %cst_95 = arith.constant dense<0.000000e+00> : vector<8x256xf32>
    %131 = tpu.matmul %130, %129, %cst_95 {dimension_numbers = #tpu.dot_dimension_numbers<[1], [0], [0], [1], [0, 0, 1, 1], [], []>} : vector<8x4xf32>, vector<4x256xf32>, vector<8x256xf32> -> vector<8x256xf32>
    %c0_96 = arith.constant 0 : index
    %c0_97 = arith.constant 0 : index
    %132 = vector.load %arg9[%c0_96, %c0_97] : memref<8x1xf32, #tpu.memory_space<vmem>>, vector<8x1xf32>
    %133 = vector.broadcast %132 : vector<8x1xf32> to vector<8x256xf32>
    %134 = arith.addf %131, %133 : vector<8x256xf32>
    %cst_98 = arith.constant 0.000000e+00 : f32
    %135 = vector.broadcast %cst_98 : f32 to vector<8x256xf32>
    %136 = arith.maximumf %134, %135 : vector<8x256xf32>
    %c0_99 = arith.constant 0 : index
    %c1_100 = arith.constant 1 : index
    %c0_101 = arith.constant 0 : index
    %c0_102 = arith.constant 0 : index
    %137 = vector.load %arg10[%c0_99, %c1_100, %c0_101, %c0_102] : memref<1x4x8x256xf32, #tpu.memory_space<vmem>>, vector<1x1x8x256xf32>
    %138 = vector.shape_cast %137 : vector<1x1x8x256xf32> to vector<8x256xf32>
    %139 = vector.shape_cast %136 : vector<8x256xf32> to vector<1x1x8x256xf32>
    tpu.vector_store %arg10[%c0_99, %c1_100, %c0_101, %c0_102], %139 {strides = array<i32>} : memref<1x4x8x256xf32, #tpu.memory_space<vmem>>, vector<1x1x8x256xf32>,
    %c8_103 = arith.constant 8 : index
    %c16_104 = arith.constant 16 : index
    %140 = vector.load %arg12[%c8_103, %c16_104] : memref<32x290xf32, #tpu.memory_space<vmem>>, vector<8x256xf32>
    %141 = vector.broadcast %20 : vector<1x256xf32> to vector<8x256xf32>
    %142 = arith.mulf %140, %141 : vector<8x256xf32>
    %c0_105 = arith.constant 0 : index
    %c17_106 = arith.constant 17 : index
    %143 = vector.load %arg12[%c0_105, %c17_106] : memref<32x290xf32, #tpu.memory_space<vmem>>, vector<8x256xf32>
    %c8_107 = arith.constant 8 : index
    %c17_108 = arith.constant 17 : index
    %144 = vector.load %arg12[%c8_107, %c17_108] : memref<32x290xf32, #tpu.memory_space<vmem>>, vector<8x256xf32>
    %c24_109 = arith.constant 24 : index
    %c16_110 = arith.constant 16 : index
    %145 = vector.load %arg12[%c24_109, %c16_110] : memref<32x290xf32, #tpu.memory_space<vmem>>, vector<8x256xf32>
    %146 = vector.broadcast %20 : vector<1x256xf32> to vector<8x256xf32>
    %147 = arith.mulf %145, %146 : vector<8x256xf32>
    %c16_111 = arith.constant 16 : index
    %c17_112 = arith.constant 17 : index
    %148 = vector.load %arg12[%c16_111, %c17_112] : memref<32x290xf32, #tpu.memory_space<vmem>>, vector<8x256xf32>
    %c24_113 = arith.constant 24 : index
    %c17_114 = arith.constant 17 : index
    %149 = vector.load %arg12[%c24_113, %c17_114] : memref<32x290xf32, #tpu.memory_space<vmem>>, vector<8x256xf32>
    %c8_115 = arith.constant 8 : index
    %c32_116 = arith.constant 32 : index
    %150 = vector.load %arg12[%c8_115, %c32_116] : memref<32x290xf32, #tpu.memory_space<vmem>>, vector<8x256xf32>
    %151 = vector.broadcast %20 : vector<1x256xf32> to vector<8x256xf32>
    %152 = arith.mulf %150, %151 : vector<8x256xf32>
    %c0_117 = arith.constant 0 : index
    %c33_118 = arith.constant 33 : index
    %153 = vector.load %arg12[%c0_117, %c33_118] : memref<32x290xf32, #tpu.memory_space<vmem>>, vector<8x256xf32>
    %c8_119 = arith.constant 8 : index
    %c33_120 = arith.constant 33 : index
    %154 = vector.load %arg12[%c8_119, %c33_120] : memref<32x290xf32, #tpu.memory_space<vmem>>, vector<8x256xf32>
    %155 = tpu.concatenate %142, %143, %144, %147, %148, %149, %152, %153, %154 in 0 : vector<8x256xf32>, vector<8x256xf32>, vector<8x256xf32>, vector<8x256xf32>, vector<8x256xf32>, vector<8x256xf32>, vector<8x256xf32>, vector<8x256xf32>, vector<8x256xf32> -> vector<72x256xf32>
    %c0_121 = arith.constant 0 : index
    %c0_122 = arith.constant 0 : index
    %156 = vector.load %arg5[%c0_121, %c0_122] : memref<4x72xf32, #tpu.memory_space<vmem>>, vector<4x72xf32>
    %cst_123 = arith.constant dense<0.000000e+00> : vector<4x256xf32>
    %157 = tpu.matmul %156, %155, %cst_123 {dimension_numbers = #tpu.dot_dimension_numbers<[1], [0], [0], [1], [0, 0, 1, 1], [], []>} : vector<4x72xf32>, vector<72x256xf32>, vector<4x256xf32> -> vector<4x256xf32>
    %c0_124 = arith.constant 0 : index
    %c0_125 = arith.constant 0 : index
    %158 = vector.load %arg6[%c0_124, %c0_125] : memref<4x1xf32, #tpu.memory_space<vmem>>, vector<4x1xf32>
    %159 = vector.broadcast %158 : vector<4x1xf32> to vector<4x256xf32>
    %160 = arith.addf %157, %159 : vector<4x256xf32>
    %cst_126 = arith.constant 0.000000e+00 : f32
    %161 = vector.broadcast %cst_126 : f32 to vector<4x256xf32>
    %162 = arith.cmpf ogt, %160, %161 : vector<4x256xf32>
    %c0_127 = arith.constant 0 : index
    %c0_128 = arith.constant 0 : index
    %163 = vector.load %arg7[%c0_127, %c0_128] : memref<4x1xf32, #tpu.memory_space<vmem>>, vector<4x1xf32>
    %164 = vector.broadcast %163 : vector<4x1xf32> to vector<4x256xf32>
    %165 = arith.mulf %160, %164 : vector<4x256xf32>
    %166 = arith.select %162, %160, %165 : vector<4x256xi1>, vector<4x256xf32>
    %c0_129 = arith.constant 0 : index
    %c0_130 = arith.constant 0 : index
    %167 = vector.load %arg8[%c0_129, %c0_130] : memref<8x4xf32, #tpu.memory_space<vmem>>, vector<8x4xf32>
    %cst_131 = arith.constant dense<0.000000e+00> : vector<8x256xf32>
    %168 = tpu.matmul %167, %166, %cst_131 {dimension_numbers = #tpu.dot_dimension_numbers<[1], [0], [0], [1], [0, 0, 1, 1], [], []>} : vector<8x4xf32>, vector<4x256xf32>, vector<8x256xf32> -> vector<8x256xf32>
    %c0_132 = arith.constant 0 : index
    %c0_133 = arith.constant 0 : index
    %169 = vector.load %arg9[%c0_132, %c0_133] : memref<8x1xf32, #tpu.memory_space<vmem>>, vector<8x1xf32>
    %170 = vector.broadcast %169 : vector<8x1xf32> to vector<8x256xf32>
    %171 = arith.addf %168, %170 : vector<8x256xf32>
    %cst_134 = arith.constant 0.000000e+00 : f32
    %172 = vector.broadcast %cst_134 : f32 to vector<8x256xf32>
    %173 = arith.maximumf %171, %172 : vector<8x256xf32>
    %c0_135 = arith.constant 0 : index
    %c2_136 = arith.constant 2 : index
    %c0_137 = arith.constant 0 : index
    %c0_138 = arith.constant 0 : index
    %174 = vector.load %arg10[%c0_135, %c2_136, %c0_137, %c0_138] : memref<1x4x8x256xf32, #tpu.memory_space<vmem>>, vector<1x1x8x256xf32>
    %175 = vector.shape_cast %174 : vector<1x1x8x256xf32> to vector<8x256xf32>
    %176 = vector.shape_cast %173 : vector<8x256xf32> to vector<1x1x8x256xf32>
    tpu.vector_store %arg10[%c0_135, %c2_136, %c0_137, %c0_138], %176 {strides = array<i32>} : memref<1x4x8x256xf32, #tpu.memory_space<vmem>>, vector<1x1x8x256xf32>,
    %c0_139 = arith.constant 0 : index
    %c17_140 = arith.constant 17 : index
    %177 = vector.load %arg12[%c0_139, %c17_140] : memref<32x290xf32, #tpu.memory_space<vmem>>, vector<8x256xf32>
    %c8_141 = arith.constant 8 : index
    %c17_142 = arith.constant 17 : index
    %178 = vector.load %arg12[%c8_141, %c17_142] : memref<32x290xf32, #tpu.memory_space<vmem>>, vector<8x256xf32>
    %c0_143 = arith.constant 0 : index
    %c18_144 = arith.constant 18 : index
    %179 = vector.load %arg12[%c0_143, %c18_144] : memref<32x290xf32, #tpu.memory_space<vmem>>, vector<8x256xf32>
    %180 = vector.broadcast %24 : vector<1x256xf32> to vector<8x256xf32>
    %181 = arith.mulf %179, %180 : vector<8x256xf32>
    %c16_145 = arith.constant 16 : index
    %c17_146 = arith.constant 17 : index
    %182 = vector.load %arg12[%c16_145, %c17_146] : memref<32x290xf32, #tpu.memory_space<vmem>>, vector<8x256xf32>
    %c24_147 = arith.constant 24 : index
    %c17_148 = arith.constant 17 : index
    %183 = vector.load %arg12[%c24_147, %c17_148] : memref<32x290xf32, #tpu.memory_space<vmem>>, vector<8x256xf32>
    %c16_149 = arith.constant 16 : index
    %c18_150 = arith.constant 18 : index
    %184 = vector.load %arg12[%c16_149, %c18_150] : memref<32x290xf32, #tpu.memory_space<vmem>>, vector<8x256xf32>
    %185 = vector.broadcast %24 : vector<1x256xf32> to vector<8x256xf32>
    %186 = arith.mulf %184, %185 : vector<8x256xf32>
    %c0_151 = arith.constant 0 : index
    %c33_152 = arith.constant 33 : index
    %187 = vector.load %arg12[%c0_151, %c33_152] : memref<32x290xf32, #tpu.memory_space<vmem>>, vector<8x256xf32>
    %c8_153 = arith.constant 8 : index
    %c33_154 = arith.constant 33 : index
    %188 = vector.load %arg12[%c8_153, %c33_154] : memref<32x290xf32, #tpu.memory_space<vmem>>, vector<8x256xf32>
    %c0_155 = arith.constant 0 : index
    %c34_156 = arith.constant 34 : index
    %189 = vector.load %arg12[%c0_155, %c34_156] : memref<32x290xf32, #tpu.memory_space<vmem>>, vector<8x256xf32>
    %190 = vector.broadcast %24 : vector<1x256xf32> to vector<8x256xf32>
    %191 = arith.mulf %189, %190 : vector<8x256xf32>
    %192 = tpu.concatenate %177, %178, %181, %182, %183, %186, %187, %188, %191 in 0 : vector<8x256xf32>, vector<8x256xf32>, vector<8x256xf32>, vector<8x256xf32>, vector<8x256xf32>, vector<8x256xf32>, vector<8x256xf32>, vector<8x256xf32>, vector<8x256xf32> -> vector<72x256xf32>
    %c0_157 = arith.constant 0 : index
    %c0_158 = arith.constant 0 : index
    %193 = vector.load %arg5[%c0_157, %c0_158] : memref<4x72xf32, #tpu.memory_space<vmem>>, vector<4x72xf32>
    %cst_159 = arith.constant dense<0.000000e+00> : vector<4x256xf32>
    %194 = tpu.matmul %193, %192, %cst_159 {dimension_numbers = #tpu.dot_dimension_numbers<[1], [0], [0], [1], [0, 0, 1, 1], [], []>} : vector<4x72xf32>, vector<72x256xf32>, vector<4x256xf32> -> vector<4x256xf32>
    %c0_160 = arith.constant 0 : index
    %c0_161 = arith.constant 0 : index
    %195 = vector.load %arg6[%c0_160, %c0_161] : memref<4x1xf32, #tpu.memory_space<vmem>>, vector<4x1xf32>
    %196 = vector.broadcast %195 : vector<4x1xf32> to vector<4x256xf32>
    %197 = arith.addf %194, %196 : vector<4x256xf32>
    %cst_162 = arith.constant 0.000000e+00 : f32
    %198 = vector.broadcast %cst_162 : f32 to vector<4x256xf32>
    %199 = arith.cmpf ogt, %197, %198 : vector<4x256xf32>
    %c0_163 = arith.constant 0 : index
    %c0_164 = arith.constant 0 : index
    %200 = vector.load %arg7[%c0_163, %c0_164] : memref<4x1xf32, #tpu.memory_space<vmem>>, vector<4x1xf32>
    %201 = vector.broadcast %200 : vector<4x1xf32> to vector<4x256xf32>
    %202 = arith.mulf %197, %201 : vector<4x256xf32>
    %203 = arith.select %199, %197, %202 : vector<4x256xi1>, vector<4x256xf32>
    %c0_165 = arith.constant 0 : index
    %c0_166 = arith.constant 0 : index
    %204 = vector.load %arg8[%c0_165, %c0_166] : memref<8x4xf32, #tpu.memory_space<vmem>>, vector<8x4xf32>
    %cst_167 = arith.constant dense<0.000000e+00> : vector<8x256xf32>
    %205 = tpu.matmul %204, %203, %cst_167 {dimension_numbers = #tpu.dot_dimension_numbers<[1], [0], [0], [1], [0, 0, 1, 1], [], []>} : vector<8x4xf32>, vector<4x256xf32>, vector<8x256xf32> -> vector<8x256xf32>
    %c0_168 = arith.constant 0 : index
    %c0_169 = arith.constant 0 : index
    %206 = vector.load %arg9[%c0_168, %c0_169] : memref<8x1xf32, #tpu.memory_space<vmem>>, vector<8x1xf32>
    %207 = vector.broadcast %206 : vector<8x1xf32> to vector<8x256xf32>
    %208 = arith.addf %205, %207 : vector<8x256xf32>
    %cst_170 = arith.constant 0.000000e+00 : f32
    %209 = vector.broadcast %cst_170 : f32 to vector<8x256xf32>
    %210 = arith.maximumf %208, %209 : vector<8x256xf32>
    %c0_171 = arith.constant 0 : index
    %c3 = arith.constant 3 : index
    %c0_172 = arith.constant 0 : index
    %c0_173 = arith.constant 0 : index
    %211 = vector.load %arg10[%c0_171, %c3, %c0_172, %c0_173] : memref<1x4x8x256xf32, #tpu.memory_space<vmem>>, vector<1x1x8x256xf32>
    %212 = vector.shape_cast %211 : vector<1x1x8x256xf32> to vector<8x256xf32>
    %213 = vector.shape_cast %210 : vector<8x256xf32> to vector<1x1x8x256xf32>
    tpu.vector_store %arg10[%c0_171, %c3, %c0_172, %c0_173], %213 {strides = array<i32>} : memref<1x4x8x256xf32, #tpu.memory_space<vmem>>, vector<1x1x8x256xf32>,
    return
  }
  func.func @transform_0(%arg0: i32) -> (i32, i32, i32) {
    %c0_i32 = arith.constant 0 : i32
    %c0_i32_0 = arith.constant 0 : i32
    %c0_i32_1 = arith.constant 0 : i32
    return %arg0, %c0_i32, %c0_i32_0 : i32, i32, i32
  }
  func.func @transform_1(%arg0: i32) -> (i32, i32) {
    %c0_i32 = arith.constant 0 : i32
    %c0_i32_0 = arith.constant 0 : i32
    %c0_i32_1 = arith.constant 0 : i32
    return %c0_i32, %c0_i32_0 : i32, i32
  }
  func.func @transform_2(%arg0: i32) -> (i32, i32) {
    %c0_i32 = arith.constant 0 : i32
    %c0_i32_0 = arith.constant 0 : i32
    %c0_i32_1 = arith.constant 0 : i32
    return %c0_i32, %c0_i32_0 : i32, i32
  }
  func.func @transform_3(%arg0: i32) -> (i32, i32) {
    %c0_i32 = arith.constant 0 : i32
    %c0_i32_0 = arith.constant 0 : i32
    %c0_i32_1 = arith.constant 0 : i32
    return %c0_i32, %c0_i32_0 : i32, i32
  }
  func.func @transform_4(%arg0: i32) -> (i32, i32) {
    %c0_i32 = arith.constant 0 : i32
    %c0_i32_0 = arith.constant 0 : i32
    %c0_i32_1 = arith.constant 0 : i32
    return %c0_i32, %c0_i32_0 : i32, i32
  }
  func.func @transform_5(%arg0: i32) -> (i32, i32) {
    %c0_i32 = arith.constant 0 : i32
    %c0_i32_0 = arith.constant 0 : i32
    %c0_i32_1 = arith.constant 0 : i32
    return %c0_i32, %c0_i32_0 : i32, i32
  }
  func.func @transform_6(%arg0: i32) -> (i32, i32) {
    %c0_i32 = arith.constant 0 : i32
    %c0_i32_0 = arith.constant 0 : i32
    %c0_i32_1 = arith.constant 0 : i32
    return %c0_i32, %c0_i32_0 : i32, i32
  }
  func.func @transform_7(%arg0: i32) -> (i32, i32) {
    %c0_i32 = arith.constant 0 : i32
    %c0_i32_0 = arith.constant 0 : i32
    %c0_i32_1 = arith.constant 0 : i32
    return %c0_i32, %c0_i32_0 : i32, i32
  }
  func.func @transform_8(%arg0: i32) -> (i32, i32) {
    %c0_i32 = arith.constant 0 : i32
    %c0_i32_0 = arith.constant 0 : i32
    %c0_i32_1 = arith.constant 0 : i32
    return %c0_i32, %c0_i32_0 : i32, i32
  }
  func.func @transform_9(%arg0: i32) -> (i32, i32, i32, i32) {
    %c0_i32 = arith.constant 0 : i32
    %c0_i32_0 = arith.constant 0 : i32
    %c0_i32_1 = arith.constant 0 : i32
    %c0_i32_2 = arith.constant 0 : i32
    return %arg0, %c0_i32, %c0_i32_0, %c0_i32_1 : i32, i32, i32, i32
  }
}

</mosaic_0001>

<bundles_post_ra>
// kernel: tile.1
= control target key start
LH: loop header
LB: loop body
LE: loop exit
PB: predicated region body
PF: predicated region fallthrough
CT: control target
= control target key end

     0   :  { %s38_s0 = inlined_call_operand.<no memory space> [shape: f32[], index: 0, kind: input, shape index: {}]   ;;  %s39_s1 = inlined_call_operand.vmem [shape: f32[32,1], index: 1, kind: output, shape index: {}]  }
   0x1   :  { %v2_v0 = vstv %s38_s0 }
   0x2   :  { %3 = vst [vmem:[%s39_s1] sm:$0xff] %v2_v0  ;;  %10 = vst [vmem:[%s39_s1 + $0x8] sm:$0xff] %v2_v0 }
   0x3   :  { %11 = vst [vmem:[%s39_s1 + $0x10] sm:$0xff] %v2_v0  ;;  %12 = vst [vmem:[%s39_s1 + $0x18] sm:$0xff] %v2_v0 }

// kernel: _lambda_.1
= control target key start
LH: loop header
LB: loop body
LE: loop exit
PB: predicated region body
PF: predicated region fallthrough
CT: control target
= control target key end

     0   :  { %s2938_s30 = smov 0   ;;  %s3650_s0 = inlined_call_operand.vmem [shape: f32[2,4,256], index: 0, kind: input, shape index: {}]   ;;  %s3651_s1 = inlined_call_operand.vmem [shape: f32[32,36], index: 1, kind: input, shape index: {}]   ;;  %s3652_s2 = inlined_call_operand.vmem [shape: f32[32,1], index: 2, kind: input, shape index: {}]   ;;  %s3653_s3 = inlined_call_operand.vmem [shape: f32[32,1], index: 3, kind: input, shape index: {}]   ;;  %s3654_s4 = inlined_call_operand.vmem [shape: f32[4,72], index: 4, kind: input, shape index: {}]   ;;  %s3655_s5 = inlined_call_operand.vmem [shape: f32[4,1], index: 5, kind: input, shape index: {}]   ;;  %s3656_s6 = inlined_call_operand.vmem [shape: f32[4,1], index: 6, kind: input, shape index: {}]   ;;  %s3657_s7 = inlined_call_operand.vmem [shape: f32[8,4], index: 7, kind: input, shape index: {}]   ;;  %s3658_s8 = inlined_call_operand.vmem [shape: f32[8,1], index: 8, kind: input, shape index: {}]   ;;  %s3659_s9 = inlined_call_operand.vmem [shape: f32[2,4,8,256], index: 9, kind: output, shape index: {}]  }
   0x1 LB: > { %s2314_s10 = sadd.s32 4294967295, %s2870_s30   ;;  %p2318_p0 = scmp.ge.s32.totalorder %s2870_s30, 1  ;;  %s2870_s30 = sphi %s2938_s30, %s19_s30  }
   0x2   : > { %p287_p1 = scmp.lt.s32.totalorder %s2870_s30, 3 }
   0x4   : > { %p288_p2 = pnand %p2318_p0, %p287_p1 }
   0x5   : > { %p323_p3 = scmp.lt.s32.totalorder (!%p288_p2), %s2314_s10, 1  ;;  %v333_v0 = vlaneseq (!%p288_p2)  ;;  %vm373_vm0 = vcmask (!%p288_p2), 273408   ;;  %v2872_v1 = vmov (!%p288_p2), 0.0   ;;  %s2873_s15 = smov (!%p288_p2), 17   ;;  %vm439_vm3 = vcmask (!%p288_p2), 277504   ;;  %v571_v59 = vld [vmem:[%s3652_s2 + $0x10] sm:$0xff] (!%p288_p2) }
   0x6   : > { %291 = sbr.rel (%p288_p2) target bundleno = 1852 (0x73c), region = 56  ;;  %372 = vst [vmem:[#allocation2] sm:$0xff] (!%p288_p2), %v2872_v1  ;;  %747 = vst [vmem:[#allocation3] sm:$0xff] (!%p288_p2), %v2872_v1  ;;  %674 = vmatprep.mubr.f32.mxu0 (!%p288_p2), %v2872_v1  ;;  %1013 = vmatprep.mubr.f32.mxu1 (!%p288_p2), %v2872_v1  ;;  %s2874_s16 = smov (!%p288_p2), 16   ;;  %vm384_vm6 = vcmask (!%p288_p2), 1043592   ;;  %vm385_vm7 = vcmask (!%p288_p2), 1047556  }
   0x7   : > { %750 = vst [vmem:[#allocation3 + $0x18] sm:$0xff] (!%p288_p2), %v2872_v1  ;;  %753 = vst [vmem:[#allocation3 + $0x30] sm:$0xff] (!%p288_p2), %v2872_v1  ;;  %v334_v2 = vand.u32 (!%p288_p2), 127, %v333_v0  ;;  %s2875_s17 = smov (!%p288_p2), 2   ;;  %s2876_s18 = smov (!%p288_p2), 32   ;;  %vm380_vm8 = vcmask (!%p288_p2), 138240  }
   0x8   : > { %756 = vst [vmem:[#allocation3 + $0x48] sm:$0xff] (!%p288_p2), %v2872_v1  ;;  %374 = vst.msk [vmem:[#allocation2 + $0x8] sm:$0xf] (!%p288_p2), %vm373_vm0, %v2872_v1  ;;  %s2877_s19 = smov (!%p288_p2), 18   ;;  %s2878_s20 = smov (!%p288_p2), 34   ;;  %vm388_vm9 = vcmask (!%p288_p2), 134144  }
   0x9   : > { %v335_v3 = vadd.s32 (!%p288_p2), 128, %v334_v2  ;;  %v340_v4 = vand.u32 (!%p288_p2), 15, %v334_v2  ;;  %749 = vst.msk [vmem:[#allocation3 + $0x10] sm:$0xff] (!%p288_p2), %vm439_vm3, %v2872_v1  ;;  %752 = vst.msk [vmem:[#allocation3 + $0x28] sm:$0xff] (!%p288_p2), %vm439_vm3, %v2872_v1  ;;  %vm403_vm11 = vcmask (!%p288_p2), 15360   ;;  %vm421_vm12 = vcmask (!%p288_p2), 146432  }
   0xa   : > { %755 = vst.msk [vmem:[#allocation3 + $0x40] sm:$0xff] (!%p288_p2), %vm439_vm3, %v2872_v1  ;;  %758 = vst.msk [vmem:[#allocation3 + $0x58] sm:$0xff] (!%p288_p2), %vm439_vm3, %v2872_v1  ;;  %s2879_s21 = smov (!%p288_p2), 111   ;;  %s2880_s22 = smov (!%p288_p2), 95   ;;  %vm412_vm13 = vcmask (!%p288_p2), 130048   ;;  %vm430_vm14 = vcmask (!%p288_p2), 261120  }
   0xb   : > { %v347_v6 = vand.u32 (!%p288_p2), 15, %v335_v3  ;;  %vm360_vm1 = vcmp.ne.s32.totalorder (!%p288_p2), %v340_v4, 0  ;;  %vm366_vm2 = vcmp.ne.s32.totalorder (!%p288_p2), %v340_v4, 15  ;;  %vm386_vm10 = vmor (!%p288_p2), %vm385_vm7, %vm384_vm6  ;;  %s2881_s23 = smov (!%p288_p2), 127   ;;  %s2882_s24 = smov (!%p288_p2), 126   ;;  %v2887_v60 = vmov (!%p288_p2), 0  }
   0xc   : > { %v2962_v7 = vsel (!%p288_p2), %vm360_vm1, 1.0, %v2872_v1  ;;  %v2965_v8 = vsel (!%p288_p2), %vm366_vm2, 1.0, %v2872_v1  ;;  %s2883_s25 = smov (!%p288_p2), 110   ;;  %s2884_s26 = smov (!%p288_p2), 96   ;;  %2490 = vset.pattern.permute.xlu1 (!%p288_p2), %v2887_v60  ;;  %2491 = vset.pattern.permute.xlu0 (!%p288_p2), %v2887_v60  ;;  %v569_v61 = vld [vmem:[%s3652_s2] sm:$0xff] (!%p288_p2)  ;;  %v709_v62 = vld [vmem:[%s3653_s3 + $0x10] sm:$0xff] (!%p288_p2) }
   0xd   : > { %s3663_s10 = smov (!%p323_p3, %s2314_s10), 1  ;;  %vm361_vm4 = vcmp.ne.s32.totalorder %v347_v6, 0  ;;  %vm367_vm5 = vcmp.ne.s32.totalorder %v347_v6, 15  ;;  %s2885_s27 = smov 112   ;;  %v570_v63 = vld [vmem:[%s3652_s2 + $0x8] sm:$0xff]  ;;  %v707_v0 = vld [vmem:[%s3653_s3] sm:$0xff] }
   0xe   : > { %s2357_s11 = sshll.u32 %s3663_s10, 3  ;;  %v2976_v9 = vsel %vm361_vm4, 1.0, %v2872_v1  ;;  %v2979_v10 = vsel %vm367_vm5, 1.0, %v2872_v1  ;;  %s2886_s28 = smov 94   ;;  %v572_v2 = vld [vmem:[%s3652_s2 + $0x18] sm:$0xff]  ;;  %v708_v3 = vld [vmem:[%s3653_s3 + $0x8] sm:$0xff] }
   0xf   : > { %s327_s14 = scalar_lea.vmem %s3650_s0, %s2357_s11  ;;  %v2983_v11 = vcombine.low %v2962_v7, %v2976_v9  ;;  %v399_v12 = vcombine.low %v2965_v8, %v2979_v10  ;;  %v710_v4 = vld [vmem:[%s3653_s3 + $0x18] sm:$0xff]  ;;  %vm458_vm15 = vcmask 1039360   ;;  %vm539_vm0 = vcmask 777216  }
  0x10   : > { %v375_v5 = vld [vmem:[%s327_s14] sm:$0xff]  ;;  %vm499_vm1 = vcmask 908288   ;;  %vm514_vm2 = vcmask 900096   ;;  %vm556_vm4 = vcmask 1043456   ;;  %vm472_vm5 = vcmask 1031168  }
  0x11   : > { %377 = vrot.lane.b32.xlu0 %v375_v5, %s2873_s15  ;;  %409 = vrot.lane.b32.xlu1 %v2983_v11, %s2874_s16  ;;  %vm487_vm6 = vcmask 916480   ;;  %vm528_vm7 = vcmask 785408  }
  0x15   : > { %400 = vrot.lane.b32.xlu0 %v399_v12, %s2875_s17  ;;  %427 = vrot.lane.b32.xlu1 %v2983_v11, %s2876_s18 }
  0x19   : > { %418 = vrot.lane.b32.xlu0 %v399_v12, %s2877_s19  ;;  %436 = vrot.lane.b32.xlu1 %v399_v12, %s2878_s20 }
  0x83   : > { %v378_v13 = vpop.permute.xlu0 %377  ;;  %v410_v18 = vpop.permute.xlu1 %409 }
  0x84   : > { %v379_v14 = vrot.slane %v378_v13, 4  ;;  %v411_v33 = vrot.slane %v410_v18, 4 }
  0x86   : > { %v381_v15 = vsel %vm380_vm8, %v379_v14, %v378_v13  ;;  %389 = vst.msk [vmem:[#allocation2 + $0x8] sm:$0xf] %vm388_vm9, %v379_v14  ;;  %v413_v38 = vsel %vm412_vm13, %v411_v33, %v410_v18  ;;  %vm553_vm9 = vcmask 769024  }
  0x87   : > { %387 = vst.msk [vmem:[#allocation2] sm:$0xff] %vm386_vm10, %v381_v15  ;;  %v401_v16 = vpop.permute.xlu0 %400  ;;  %v428_v28 = vpop.permute.xlu1 %427  ;;  %vm593_vm10 = vcmask 293888  }
  0x88   : > { %v402_v20 = vrot.slane %v401_v16, 4  ;;  %v429_v35 = vrot.slane %v428_v28, 4 }
  0x8a   : > { %v404_v26 = vsel %vm403_vm11, %v402_v20, %v401_v16  ;;  %v431_v42 = vsel %vm430_vm14, %v429_v35, %v428_v28 }
  0x8b   : > { %v419_v17 = vpop.permute.xlu0 %418  ;;  %v437_v43 = vpop.permute.xlu1 %436 }
  0x8c   : > { %v420_v21 = vrot.slane %v419_v17, 4  ;;  %v438_v48 = vrot.slane %v437_v43, 4 }
  0x8d   : > { %v2995_v19 = vld [vmem:[#allocation2 + $0x8] sm:$0xf] }
  0x8e   : > { %v2997_v22 = vld [vmem:[#allocation2] sm:$0xff]  ;;  %v451_v23 = vcombine.low %v2995_v19, %v2995_v19  ;;  %v426_v24 = vmul.f32 %v420_v21, %v2995_v19  ;;  %v422_v27 = vsel %vm421_vm12, %v420_v21, %v419_v17  ;;  %v417_v39 = vmul.f32 %v411_v33, %v2995_v19 }
  0x8f   : > { %493 = vrot.lane.b32.xlu0 %v2997_v22, %s2879_s21  ;;  %v425_v29 = vmul.f32 %v422_v27, %v2997_v22  ;;  %v450_v30 = vcombine.low %v2997_v22, %v2997_v22  ;;  %v407_v31 = vmul.f32 %v404_v26, %v2997_v22  ;;  %v492_v34 = vcombine.high %v2997_v22, %v2997_v22 }
  0x90   : > { %v2460_v25 = vpack.i.bf16 %v451_v23, %v2997_v22  ;;  %v507_v32 = vcombine.low %v426_v24, %v426_v24  ;;  %v408_v41 = vmul.f32 %v402_v20, %v2995_v19  ;;  %v416_v44 = vmul.f32 %v413_v38, %v2997_v22 }
  0x91   : > { %v465_v37 = vcombine.high %v407_v31, %v407_v31  ;;  %v2465_v40 = vpack.i.bf16 %v2995_v19, %v492_v34  ;;  %v434_v46 = vmul.f32 %v431_v42, %v2997_v22  ;;  %v480_v47 = vcombine.low %v417_v39, %v417_v39 }
  0x92   : > { %2461 = vrot.lane.b32.xlu1 %v2460_v25, %s2880_s22  ;;  %v2475_v36 = vpack.i.bf16 %v507_v32, %v425_v29  ;;  %v479_v49 = vcombine.low %v416_v44, %v416_v44  ;;  %v440_v52 = vsel %vm439_vm3, %v438_v48, %v437_v43  ;;  %v435_v53 = vmul.f32 %v429_v35, %v2995_v19 }
  0x93   : > { %2456 = vrot.lane.b32.xlu0 %v2460_v25, %s2881_s23  ;;  %v2480_v45 = vpack.i.bf16 %v408_v41, %v465_v37  ;;  %v2470_v50 = vpack.i.bf16 %v480_v47, %v416_v44  ;;  %v521_v51 = vcombine.high %v434_v46, %v434_v46  ;;  %v506_v54 = vcombine.low %v425_v29, %v425_v29 }
  0x94   : > { %v443_v55 = vmul.f32 %v440_v52, %v2997_v22  ;;  %v444_v58 = vmul.f32 %v438_v48, %v2995_v19  ;;  %v395_v17 = vmul.f32 %v2983_v11, %v2997_v22 }
  0x95   : > { %v2485_v56 = vpack.i.bf16 %v435_v53, %v521_v51 }
  0x96   : > { %452 = vrot.lane.b32.xlu1 %v450_v30, %s2881_s23  ;;  %v546_v57 = vcombine.high %v443_v55, %v443_v55  ;;  %v446_v23 = vcombine.high %v395_v17, %v395_v17 }
  0x97   : > { %466 = vrot.lane.b32.xlu0 %v407_v31, %s2882_s24 }
  0x9a   : > { %2476 = vrot.lane.b32.xlu1 %v2475_v36, %s2883_s25 }
  0x9b   : > { %2466 = vrot.lane.b32.xlu0 %v2465_v40, %s2879_s21 }
  0x9e   : > { %2481 = vrot.lane.b32.xlu1 %v2480_v45, %s2882_s24 }
  0x9f   : > { %522 = vrot.lane.b32.xlu0 %v434_v46, %s2884_s26 }
  0xa2   : > { %481 = vrot.lane.b32.xlu1 %v479_v49, %s2885_s27 }
  0xa3   : > { %2471 = vrot.lane.b32.xlu0 %v2470_v50, %s2885_s27 }
  0xa6   : > { %508 = vrot.lane.b32.xlu1 %v506_v54, %s2883_s25 }
  0xa7   : > { %2486 = vrot.lane.b32.xlu0 %v2485_v56, %s2884_s26  ;;  %s2358_s26 = sshll.u32 %s3663_s10, 6 }
  0xaa   : > { %533 = vrot.lane.b32.xlu1 %v450_v30, %s2880_s22 }
  0xab   : > { %549 = vrot.lane.b32.xlu0 %v546_v57, %s2886_s28 }
  0xae   : > { %551 = vrot.lane.b32.xlu1 %v444_v58, %s2886_s28 }
  0xaf   : > { %547 = vrot.lane.b32.xlu0 %v443_v55, %s2886_s28 }
  0xb2   : > { %585 = vperm.xlu1 %2490, %v571_v59  }
  0xb3   : > { %575 = vperm.xlu0 %2491, %v569_v61  }
  0xb6   : > { %723 = vperm.xlu1 %2490, %v709_v62  }
  0xb7   : > { %580 = vperm.xlu0 %2491, %v570_v63  }
  0xba   : > { %713 = vperm.xlu1 %2490, %v707_v0  }
  0xbb   : > { %590 = vperm.xlu0 %2491, %v572_v2  }
  0xbe   : > { %718 = vperm.xlu1 %2490, %v708_v3  }
  0xc2   : > { %728 = vperm.xlu1 %2490, %v710_v4  }
 0x101   : > { %v494_v5 = vpop.permute.xlu0 %493 }
 0x104   : > { %v2462_v6 = vpop.permute.xlu1 %2461 }
 0x105   : > { %v2457_v12 = vpop.permute.xlu0 %2456  ;;  %v2464_v34 = vunpack.i.h.bf16 %v2462_v6  ;;  %v2463_v35 = vunpack.i.l.bf16 %v2462_v6 }
 0x106   : > { %v2459_v18 = vunpack.i.h.bf16 %v2457_v12  ;;  %v2458_v19 = vunpack.i.l.bf16 %v2457_v12 }
 0x107   : > { %v541_v53 = vsel %vm539_vm0, %v2463_v35, %v2464_v34 }
 0x108   : > { %v453_v13 = vpop.permute.xlu1 %452  ;;  %v460_v27 = vsel %vm458_vm15, %v2458_v19, %v2459_v18 }
 0x109   : > { %v467_v14 = vpop.permute.xlu0 %466  ;;  %v459_v28 = vsel %vm458_vm15, %v453_v13, %v2458_v19  ;;  %v558_v36 = vsel %vm556_vm4, %v446_v23, %v460_v27  ;;  %v566_v13 = vld [vmem:[%s3651_s1 + $0x8] sm:$0xff] }
 0x10a   : > { %v557_v45 = vsel %vm556_vm4, %v395_v17, %v459_v28 }
 0x10c   : > { %v2477_v15 = vpop.permute.xlu1 %2476 }
 0x10d   : > { %v2467_v16 = vpop.permute.xlu0 %2466  ;;  %v2479_v29 = vunpack.i.h.bf16 %v2477_v15  ;;  %v2478_v11 = vunpack.i.l.bf16 %v2477_v15  ;;  %v568_v15 = vld [vmem:[%s3651_s1 + $0x18] sm:$0xff] }
 0x10e   : > { %v2469_v30 = vunpack.i.h.bf16 %v2467_v16  ;;  %v2468_v31 = vunpack.i.l.bf16 %v2467_v16 }
 0x10f   : > { %v516_v42 = vsel %vm514_vm2, %v2478_v11, %v2479_v29 }
 0x110   : > { %v2482_v20 = vpop.permute.xlu1 %2481  ;;  %v501_v50 = vsel %vm499_vm1, %v2468_v31, %v2469_v30  ;;  %v500_v57 = vsel %vm499_vm1, %v494_v5, %v2468_v31  ;;  %v565_v5 = vld [vmem:[%s3651_s1] sm:$0xff] }
 0x111   : > { %v523_v21 = vpop.permute.xlu0 %522  ;;  %v2484_v24 = vunpack.i.h.bf16 %v2482_v20  ;;  %v2483_v25 = vunpack.i.l.bf16 %v2482_v20  ;;  %v562_v60 = vsel %vm556_vm4, %v501_v50, %v516_v42 }
 0x113   : > { %v474_v38 = vsel %vm472_vm5, %v2483_v25, %v2484_v24  ;;  %v473_v40 = vsel %vm472_vm5, %v467_v14, %v2483_v25  ;;  %v567_v14 = vld [vmem:[%s3651_s1 + $0x10] sm:$0xff] }
 0x114   : > { %v482_v26 = vpop.permute.xlu1 %481 }
 0x115   : > { %v2472_v22 = vpop.permute.xlu0 %2471 }
 0x116   : > { %v2474_v32 = vunpack.i.h.bf16 %v2472_v22  ;;  %v2473_v33 = vunpack.i.l.bf16 %v2472_v22 }
 0x118   : > { %v509_v37 = vpop.permute.xlu1 %508  ;;  %v489_v39 = vsel %vm487_vm6, %v2473_v33, %v2474_v32  ;;  %v488_v41 = vsel %vm487_vm6, %v482_v26, %v2473_v33 }
 0x119   : > { %v2487_v43 = vpop.permute.xlu0 %2486  ;;  %v560_v44 = vsel %vm556_vm4, %v474_v38, %v489_v39  ;;  %v559_v46 = vsel %vm556_vm4, %v473_v40, %v488_v41  ;;  %v515_v51 = vsel %vm514_vm2, %v509_v37, %v2478_v11 }
 0x11a   : > { %v2489_v47 = vunpack.i.h.bf16 %v2487_v43  ;;  %v2488_v48 = vunpack.i.l.bf16 %v2487_v43  ;;  %v2359_v49 = vpack.c.bf16 %v560_v44, %v558_v36  ;;  %v2361_v52 = vpack.c.bf16 %v559_v46, %v557_v45 }
 0x11b   : > { %v561_v62 = vsel %vm556_vm4, %v500_v57, %v515_v51 }
 0x11c   : > { %v534_v54 = vpop.permute.xlu1 %533  ;;  %v529_v55 = vsel %vm528_vm7, %v523_v21, %v2488_v48  ;;  %2360 = vmatprep.subr.bf16.mxu0 %v2359_v49  ;;  %v530_v56 = vsel %vm528_vm7, %v2488_v48, %v2489_v47 }
 0x11d   : > { %v540_v58 = vsel %vm539_vm0, %v534_v54, %v2463_v35  ;;  %v550_v59 = vpop.permute.xlu0 %549  ;;  %2362 = vmatpush1.bf16.msra.mxu0 %v2361_v52  ;;  %v564_v61 = vsel %vm556_vm4, %v530_v56, %v541_v53  ;;  %v3104_v52 = vpack.i.bf16 %v2979_v10, %v2965_v8  ;;  %v3113_v56 = vpack.i.bf16 %v2976_v9, %v2962_v7 }
 0x11e   : > { %v563_v63 = vsel %vm556_vm4, %v529_v55, %v540_v58  ;;  %v2363_v0 = vpack.c.bf16 %v564_v61, %v562_v60 }
 0x11f   : > { %v2365_v2 = vpack.c.bf16 %v563_v63, %v561_v62 }
 0x120   : > { %v552_v3 = vpop.permute.xlu1 %551  ;;  %2364 = vmatprep.subr.bf16.mxu0 %v2363_v0 }
 0x121   : > { %v555_v4 = vsel %vm553_vm9, %v550_v59, %v552_v3  ;;  %v548_v6 = vpop.permute.xlu0 %547  ;;  %2366 = vmatpush1.bf16.msra.mxu0 %v2365_v2 }
 0x122   : > { %2327 = vmatprep.subr.msk.mxu0 %vm556_vm4, %v555_v4  ;;  %v554_v12 = vsel %vm553_vm9, %v548_v6, %v550_v59 }
 0x125   : > { %2328 = vmatpush1.msk.msra.mxu0 %vm556_vm4, %v554_v12 }
 0x126   : > { %2329 = vmatmul.mubr.msk.f32.vlgmr.msra.gmra.mrb[0].mxu0 %vm593_vm10, %v565_v5 }
 0x127   : > { %680 = vmatprep.mubr.f32.mxu0 %v2872_v1 }
 0x12a   : > { %2330 = vmatmul.mubr.msk.f32.gmra.mrb[2].mxu0 %vm593_vm10, %v566_v13 }
 0x12b   : > { %686 = vmatprep.mubr.f32.mxu0 %v2872_v1 }
 0x12e   : > { %2331 = vmatmul.mubr.msk.f32.gmra.mrb[4].mxu0 %vm593_vm10, %v567_v14 }
 0x12f   : > { %692 = vmatprep.mubr.f32.mxu0 %v2872_v1 }
 0x131   : > { %v586_v16 = vpop.permute.xlu1 %585 }
 0x132   : > { %2332 = vmatmul.mubr.msk.f32.gmra.mrb[6].mxu0 %vm593_vm10, %v568_v15  ;;  %v576_v18 = vpop.permute.xlu0 %575 }
 0x133   : > { %1402 = vmatprep.mubr.f32.mxu0 %v2872_v1 }
 0x135   : > { %v724_v17 = vpop.permute.xlu1 %723 }
 0x136   : > { %v581_v22 = vpop.permute.xlu0 %580 }
 0x139   : > { %v714_v23 = vpop.permute.xlu1 %713 }
 0x13a   : > { %v591_v41 = vpop.permute.xlu0 %590 }
 0x13d   : > { %v719_v36 = vpop.permute.xlu1 %718 }
 0x141   : > { %v729_v47 = vpop.permute.xlu1 %728 }
 0x1f9   : > { %v676_v19 = vpop.f32.mrb[0].mxu0 }
 0x1fa   : > { %v677_v20 = vadd.f32 %v676_v19, %v576_v18  ;;  %v678_v21 = vpop.f32.mrb[1].mxu0 }
 0x1fb   : > { %v679_v24 = vadd.f32 %v678_v21, %v576_v18 }
 0x1fc   : > { %v731_v25 = vmul.f32 %v714_v23, %v677_v20  ;;  %vm699_vm0 = vcmp.gt.f32.partialorder %v677_v20, 0.0 }
 0x1fd   : > { %v732_v26 = vmul.f32 %v714_v23, %v679_v24  ;;  %v682_v27 = vpop.f32.mrb[2].mxu0  ;;  %vm700_vm2 = vcmp.gt.f32.partialorder %v679_v24, 0.0 }
 0x1fe   : > { %v684_v28 = vpop.f32.mrb[3].mxu0  ;;  %v739_v29 = vsel %vm699_vm0, %v677_v20, %v731_v25  ;;  %v683_v31 = vadd.f32 %v682_v27, %v581_v22 }
 0x1ff   : > { %767 = vrot.lane.b32.xlu0 %v739_v29, %s2873_s15  ;;  %v740_v11 = vsel %vm700_vm2, %v679_v24, %v732_v26  ;;  %v685_v34 = vadd.f32 %v684_v28, %v581_v22 }
 0x200   : > { %769 = vrot.lane.b32.xlu1 %v740_v11, %s2873_s15  ;;  %v733_v40 = vmul.f32 %v719_v36, %v683_v31  ;;  %vm701_vm9 = vcmp.gt.f32.partialorder %v683_v31, 0.0 }
 0x201   : > { %v688_v30 = vpop.f32.mrb[4].mxu0  ;;  %v734_v44 = vmul.f32 %v719_v36, %v685_v34  ;;  %vm702_vm10 = vcmp.gt.f32.partialorder %v685_v34, 0.0 }
 0x202   : > { %v689_v32 = vadd.f32 %v688_v30, %v586_v16  ;;  %v690_v33 = vpop.f32.mrb[5].mxu0  ;;  %v741_v49 = vsel %vm701_vm9, %v683_v31, %v733_v40 }
 0x203   : > { %v691_v35 = vadd.f32 %v690_v33, %v586_v16  ;;  %v742_v51 = vsel %vm702_vm10, %v685_v34, %v734_v44 }
 0x204   : > { %v735_v37 = vmul.f32 %v724_v17, %v689_v32  ;;  %vm703_vm5 = vcmp.gt.f32.partialorder %v689_v32, 0.0 }
 0x205   : > { %v736_v38 = vmul.f32 %v724_v17, %v691_v35  ;;  %v694_v39 = vpop.f32.mrb[6].mxu0  ;;  %vm704_vm7 = vcmp.gt.f32.partialorder %v691_v35, 0.0 }
 0x206   : > { %v696_v42 = vpop.f32.mrb[7].mxu0  ;;  %v743_v43 = vsel %vm703_vm5, %v689_v32, %v735_v37  ;;  %v695_v45 = vadd.f32 %v694_v39, %v591_v41  ;;  %vm799_vm5 = vcmask 1047688  }
 0x207   : > { %775 = vrot.lane.b32.xlu0 %v743_v43, %s2873_s15  ;;  %v744_v46 = vsel %vm704_vm7, %v691_v35, %v736_v38  ;;  %v697_v48 = vadd.f32 %v696_v42, %v591_v41 }
 0x208   : > { %777 = vrot.lane.b32.xlu1 %v744_v46, %s2873_s15  ;;  %v737_v50 = vmul.f32 %v729_v47, %v695_v45  ;;  %vm705_vm0 = vcmp.gt.f32.partialorder %v695_v45, 0.0 }
 0x209   : > { %v738_v53 = vmul.f32 %v729_v47, %v697_v48  ;;  %vm706_vm2 = vcmp.gt.f32.partialorder %v697_v48, 0.0 }
 0x20a   : > { %v745_v54 = vsel %vm705_vm0, %v695_v45, %v737_v50 }
 0x20b   : > { %771 = vrot.lane.b32.xlu0 %v741_v49, %s2873_s15  ;;  %v746_v55 = vsel %vm706_vm2, %v697_v48, %v738_v53 }
 0x20c   : > { %773 = vrot.lane.b32.xlu1 %v742_v51, %s2873_s15 }
 0x20f   : > { %2493 = vrot.lane.b32.xlu0 %v3104_v52, %s2875_s17 }
 0x210   : > { %779 = vrot.lane.b32.xlu1 %v745_v54, %s2873_s15 }
 0x213   : > { %781 = vrot.lane.b32.xlu0 %v746_v55, %s2873_s15 }
 0x214   : > { %2498 = vrot.lane.b32.xlu1 %v3104_v52, %s2877_s19 }
 0x217   : > { %2503 = vrot.lane.b32.xlu0 %v3113_v56, %s2874_s16 }
 0x271   : > { %v768_v8 = vpop.permute.xlu0 %767 }
 0x272   : > { %800 = vst.msk [vmem:[#allocation3] sm:$0xff] %vm799_vm5, %v768_v8  ;;  %v770_v10 = vpop.permute.xlu1 %769 }
 0x273   : > { %v783_v57 = vsel %vm380_vm8, %v768_v8, %v770_v10  ;;  %802 = vst.msk [vmem:[#allocation3 + $0x10] sm:$0xff] %vm380_vm8, %v770_v10 }
 0x274   : > { %801 = vst [vmem:[#allocation3 + $0x8] sm:$0xff] %v783_v57 }
 0x279   : > { %v776_v58 = vpop.permute.xlu0 %775  ;;  %v3172_v39 = vld [vmem:[#allocation3] sm:$0xff] }
 0x27a   : > { %806 = vst.msk [vmem:[#allocation3 + $0x30] sm:$0xff] %vm799_vm5, %v776_v58  ;;  %v778_v59 = vpop.permute.xlu1 %777  ;;  %v1143_v60 = vld [vmem:[#allocation3 + $0x10] sm:$0xff] }
 0x27b   : > { %v785_v61 = vsel %vm380_vm8, %v776_v58, %v778_v59  ;;  %808 = vst.msk [vmem:[#allocation3 + $0x40] sm:$0xff] %vm380_vm8, %v778_v59  ;;  %v3125_v62 = vpack.i.bf16 %v1143_v60, %v783_v57 }
 0x27d   : > { %v772_v63 = vpop.permute.xlu0 %771  ;;  %2508 = vrot.lane.b32.xlu0 %v3125_v62, %s2885_s27 }
 0x27e   : > { %803 = vst.msk [vmem:[#allocation3 + $0x18] sm:$0xff] %vm799_vm5, %v772_v63  ;;  %v774_v0 = vpop.permute.xlu1 %773 }
 0x27f   : > { %v3131_v2 = vsel %vm380_vm8, %v772_v63, %v774_v0  ;;  %805 = vst.msk [vmem:[#allocation3 + $0x28] sm:$0xff] %vm380_vm8, %v774_v0 }
 0x280   : > { %804 = vst [vmem:[#allocation3 + $0x20] sm:$0xff] %v3131_v2  ;;  %v3178_v42 = vpack.i.bf16 %v3131_v2, %v3172_v39 }
 0x281   : > { %v2494_v3 = vpop.permute.xlu0 %2493  ;;  %v3140_v16 = vld [vmem:[#allocation3 + $0x30] sm:$0xff] }
 0x282   : > { %v1126_v4 = vld [vmem:[#allocation3 + $0x40] sm:$0xff]  ;;  %v780_v6 = vpop.permute.xlu1 %779  ;;  %v2495_v5 = vunpack.i.l.bf16 %v2494_v3  ;;  %v2496_v13 = vunpack.i.h.bf16 %v2494_v3 }
 0x283   : > { %809 = vst.msk [vmem:[#allocation3 + $0x48] sm:$0xff] %vm799_vm5, %v780_v6  ;;  %v3136_v12 = vpack.i.bf16 %v1126_v4, %v785_v61  ;;  %v2552_v55 = vpack.i.bf16 %v3140_v16, %v1126_v4 }
 0x284   : > { %v1138_v20 = vmul.f32 %v2495_v5, %v3140_v16  ;;  %v1134_v25 = vsel %vm403_vm11, %v2495_v5, %v2496_v13  ;;  %v1140_v30 = vmul.f32 %v2496_v13, %v1126_v4 }
 0x285   : > { %v782_v14 = vpop.permute.xlu0 %781  ;;  %v3138_v15 = vld [vmem:[#allocation3 + $0x18] sm:$0xff]  ;;  %v1139_v32 = vmul.f32 %v1134_v25, %v785_v61 }
 0x286   : > { %v3143_v17 = vsel %vm380_vm8, %v780_v6, %v782_v14  ;;  %811 = vst.msk [vmem:[#allocation3 + $0x58] sm:$0xff] %vm380_vm8, %v782_v14  ;;  %v2499_v18 = vpop.permute.xlu1 %2498  ;;  %v3146_v19 = vld [vmem:[#allocation3 + $0x28] sm:$0xff]  ;;  %v2527_v31 = vpack.i.bf16 %v785_v61, %v1138_v20  ;;  %vm945_vm8 = vcmask 588800  }
 0x287   : > { %810 = vst [vmem:[#allocation3 + $0x50] sm:$0xff] %v3143_v17  ;;  %v2501_v21 = vunpack.i.h.bf16 %v2499_v18  ;;  %v2500_v23 = vunpack.i.l.bf16 %v2499_v18  ;;  %v3152_v24 = vpack.i.bf16 %v3138_v15, %v3146_v19  ;;  %v2532_v38 = vpack.i.bf16 %v1140_v30, %v1139_v32 }
 0x288   : > { %v3237_v8 = vpack.i.bf16 %v3146_v19, %v3131_v2 }
 0x289   : > { %2518 = vrot.lane.b32.xlu1 %v3152_v24, %s2885_s27  ;;  %v2504_v26 = vpop.permute.xlu0 %2503  ;;  %v1151_v27 = vsel %vm421_vm12, %v2500_v23, %v2501_v21  ;;  %v1157_v28 = vmul.f32 %v2501_v21, %v1143_v60  ;;  %v3186_v45 = vmul.f32 %v2500_v23, %v3140_v16  ;;  %v3188_v46 = vmul.f32 %v2501_v21, %v1126_v4 }
 0x28a   : > { %v2506_v29 = vunpack.i.h.bf16 %v2504_v26  ;;  %v2505_v11 = vunpack.i.l.bf16 %v2504_v26  ;;  %v1156_v22 = vmul.f32 %v1151_v27, %v783_v57  ;;  %v3191_v47 = vmul.f32 %v2500_v23, %v3172_v39  ;;  %v3203_v51 = vld [vmem:[#allocation3 + $0x48] sm:$0xff] }
 0x28b   : > { %v3195_v48 = vmul.f32 %v1151_v27, %v785_v61  ;;  %v3213_v54 = vpack.i.bf16 %v3203_v51, %v3140_v16  ;;  %v3248_v57 = vpack.i.bf16 %v3138_v15, %v3172_v39 }
 0x28c   : > { %v3158_v33 = vpack.i.bf16 %v1157_v28, %v1156_v22  ;;  %v827_v34 = vsel %vm412_vm13, %v2505_v11, %v2506_v29  ;;  %v1518_v41 = vmul.f32 %v2506_v29, %v3146_v19  ;;  %v3244_v10 = vmul.f32 %v2505_v11, %v3203_v51 }
 0x28d   : > { %2528 = vrot.lane.b32.xlu1 %v2527_v31, %s2881_s23  ;;  %v3162_v35 = vld [vmem:[#allocation3 + $0x58] sm:$0xff]  ;;  %v3167_v36 = vmul.f32 %v827_v34, %v3143_v17  ;;  %v1517_v40 = vmul.f32 %v827_v34, %v3131_v2  ;;  %v3260_v59 = vmul.f32 %v2505_v11, %v3138_v15  ;;  %vm1039_vm13 = vcmask 31744  }
 0x28e   : > { %2513 = vrot.lane.b32.xlu0 %v3158_v33, %s2879_s21  ;;  %v3170_v37 = vmul.f32 %v2506_v29, %v3162_v35  ;;  %v3209_v53 = vpack.i.bf16 %v3162_v35, %v3143_v17 }
 0x28f   : > { %v3183_v44 = vpack.i.bf16 %v1518_v41, %v1517_v40  ;;  %v2607_v60 = vpack.i.bf16 %v3167_v36, %v3260_v59 }
 0x290   : > { %v2722_v43 = vpack.i.bf16 %v3170_v37, %v3167_v36  ;;  %v2602_v58 = vpack.i.bf16 %v3244_v10, %v3170_v37 }
 0x291   : > { %2533 = vrot.lane.b32.xlu1 %v2532_v38, %s2881_s23 }
 0x292   : > { %2523 = vrot.lane.b32.xlu0 %v3178_v42, %s2885_s27 }
 0x295   : > { %1197 = vrot.lane.b32.xlu1 %v3191_v47, %s2879_s21 }
 0x296   : > { %2538 = vrot.lane.b32.xlu0 %v3136_v12, %s2885_s27 }
 0x299   : > { %2548 = vrot.lane.b32.xlu1 %v3209_v53, %s2885_s27 }
 0x29a   : > { %2543 = vrot.lane.b32.xlu0 %v3213_v54, %s2885_s27 }
 0x29d   : > { %1232 = vrot.lane.b32.xlu1 %v3195_v48, %s2879_s21 }
 0x29e   : > { %1234 = vrot.lane.b32.xlu0 %v3188_v46, %s2879_s21 }
 0x2a1   : > { %1230 = vrot.lane.b32.xlu1 %v3186_v45, %s2879_s21 }
 0x2a2   : > { %2553 = vrot.lane.b32.xlu0 %v2552_v55, %s2881_s23 }
 0x2a5   : > { %2558 = vrot.lane.b32.xlu1 %v3136_v12, %s2881_s23 }
 0x2a6   : > { %2563 = vrot.lane.b32.xlu0 %v3183_v44, %s2885_s27 }
 0x2a9   : > { %2568 = vrot.lane.b32.xlu1 %v3213_v54, %s2881_s23 }
 0x2aa   : > { %2573 = vrot.lane.b32.xlu0 %v3125_v62, %s2879_s21 }
 0x2ad   : > { %2578 = vrot.lane.b32.xlu1 %v3237_v8, %s2879_s21 }
 0x2ae   : > { %2593 = vrot.lane.b32.xlu0 %v3209_v53, %s2881_s23 }
 0x2b1   : > { %2583 = vrot.lane.b32.xlu1 %v3248_v57, %s2879_s21 }
 0x2b2   : > { %2603 = vrot.lane.b32.xlu0 %v2602_v58, %s2885_s27 }
 0x2b5   : > { %2588 = vrot.lane.b32.xlu1 %v3136_v12, %s2879_s21 }
 0x2b9   : > { %918 = vrot.lane.b32.xlu1 %v3140_v16, %s2879_s21 }
 0x2bd   : > { %2598 = vrot.lane.b32.xlu1 %v3209_v53, %s2881_s23 }
 0x2c1   : > { %2608 = vrot.lane.b32.xlu1 %v2607_v60, %s2885_s27 }
 0x2ef   : > { %v2509_v63 = vpop.permute.xlu0 %2508 }
 0x2f0   : > { %v2510_v16 = vunpack.i.l.bf16 %v2509_v63  ;;  %v2511_v27 = vunpack.i.h.bf16 %v2509_v63 }
 0x2f2   : > { %v1182_v60 = vsel %vm487_vm6, %v2510_v16, %v2511_v27 }
 0x2fb   : > { %v2519_v61 = vpop.permute.xlu1 %2518 }
 0x2fc   : > { %v2520_v5 = vunpack.i.l.bf16 %v2519_v61  ;;  %v2521_v21 = vunpack.i.h.bf16 %v2519_v61 }
 0x2ff   : > { %v3267_v0 = vpop.permute.xlu1 %2528 }
 0x300   : > { %v2514_v3 = vpop.permute.xlu0 %2513  ;;  %v2530_v28 = vunpack.i.l.bf16 %v3267_v0 }
 0x301   : > { %v2516_v4 = vunpack.i.h.bf16 %v2514_v3  ;;  %v2515_v6 = vunpack.i.l.bf16 %v2514_v3 }
 0x303   : > { %v2534_v13 = vpop.permute.xlu1 %2533  ;;  %v1204_v14 = vsel %vm499_vm1, %v2515_v6, %v2516_v4 }
 0x304   : > { %v2524_v18 = vpop.permute.xlu0 %2523  ;;  %v2612_v20 = vpack.i.bf16 %v1204_v14, %v2520_v5  ;;  %v2535_v23 = vunpack.i.l.bf16 %v2534_v13  ;;  %v2536_v31 = vunpack.i.h.bf16 %v2534_v13 }
 0x305   : > { %v2526_v25 = vunpack.i.h.bf16 %v2524_v18  ;;  %v2525_v26 = vunpack.i.l.bf16 %v2524_v18 }
 0x306   : > { %2613 = vrot.lane.b32.xlu0 %v2612_v20, %s2881_s23  ;;  %v1170_v55 = vsel %vm458_vm15, %v2530_v28, %v2535_v23  ;;  %v2627_v63 = vpack.i.bf16 %v1182_v60, %v2536_v31 }
 0x307   : > { %v1198_v29 = vpop.permute.xlu1 %1197  ;;  %v1181_v11 = vsel %vm487_vm6, %v2525_v26, %v2510_v16  ;;  %v1193_v22 = vsel %vm487_vm6, %v2526_v25, %v2520_v5  ;;  %v1192_v30 = vsel %vm487_vm6, %v2521_v21, %v2526_v25  ;;  %v2642_v3 = vpack.i.bf16 %v1170_v55, %v2511_v27 }
 0x308   : > { %v2539_v32 = vpop.permute.xlu0 %2538  ;;  %v2617_v34 = vpack.i.bf16 %v1193_v22, %v1181_v11  ;;  %v2622_v38 = vpack.i.bf16 %v1192_v30, %v2516_v4  ;;  %v1203_v4 = vsel %vm499_vm1, %v1198_v29, %v2515_v6  ;;  %v1171_v21 = vsel %vm458_vm15, %v2535_v23, %v2536_v31 }
 0x309   : > { %v2541_v40 = vunpack.i.h.bf16 %v2539_v32  ;;  %v2540_v41 = vunpack.i.l.bf16 %v2539_v32  ;;  %v2637_v6 = vpack.i.bf16 %v1171_v21, %v3203_v51  ;;  %v2531_v29 = vunpack.i.h.bf16 %v3267_v0 }
 0x30a   : > { %2618 = vrot.lane.b32.xlu0 %v2617_v34, %s2881_s23  ;;  %2623 = vrot.lane.b32.xlu1 %v2622_v38, %s2881_s23  ;;  %v815_v23 = vmul.f32 %v2976_v9, %v3143_v17  ;;  %v814_v31 = vmul.f32 %v2962_v7, %v3203_v51 }
 0x30b   : > { %v2549_v58 = vpop.permute.xlu1 %2548  ;;  %v1215_v13 = vsel %vm487_vm6, %v2540_v41, %v2541_v40 }
 0x30c   : > { %v2544_v61 = vpop.permute.xlu0 %2543  ;;  %v2632_v20 = vpack.i.bf16 %v1215_v13, %v1203_v4  ;;  %v2551_v25 = vunpack.i.h.bf16 %v2549_v58  ;;  %v2550_v11 = vunpack.i.l.bf16 %v2549_v58 }
 0x30d   : > { %v2545_v5 = vunpack.i.l.bf16 %v2544_v61  ;;  %v2546_v60 = vunpack.i.h.bf16 %v2544_v61 }
 0x30e   : > { %2628 = vrot.lane.b32.xlu0 %v2627_v63, %s2881_s23  ;;  %2643 = vrot.lane.b32.xlu1 %v2642_v3, %s2881_s23  ;;  %v1226_v58 = vsel %vm487_vm6, %v2550_v11, %v2551_v25 }
 0x30f   : > { %v3283_v14 = vpop.permute.xlu1 %1232  ;;  %v1214_v16 = vsel %vm487_vm6, %v2545_v5, %v2540_v41 }
 0x310   : > { %v3285_v18 = vpop.permute.xlu0 %1234  ;;  %v2647_v28 = vpack.i.bf16 %v1214_v16, %v2551_v25 }
 0x312   : > { %2633 = vrot.lane.b32.xlu0 %v2632_v20, %s2881_s23  ;;  %930 = vrot.lane.b32.xlu1 %v3143_v17, %s2879_s21  ;;  %v2652_v17 = vpack.i.bf16 %v1226_v58, %v2541_v40  ;;  %v1225_v40 = vsel %vm487_vm6, %v2546_v60, %v2550_v11 }
 0x313   : > { %v3292_v26 = vpop.permute.xlu1 %1230 }
 0x314   : > { %v2554_v27 = vpop.permute.xlu0 %2553 }
 0x315   : > { %v2556_v22 = vunpack.i.h.bf16 %v2554_v27  ;;  %v2555_v30 = vunpack.i.l.bf16 %v2554_v27 }
 0x316   : > { %2638 = vrot.lane.b32.xlu0 %v2637_v6, %s2881_s23  ;;  %2648 = vrot.lane.b32.xlu1 %v2647_v28, %s2881_s23 }
 0x317   : > { %v2559_v32 = vpop.permute.xlu1 %2558  ;;  %v850_v34 = vsel %vm458_vm15, %v2531_v29, %v2555_v30  ;;  %v849_v38 = vsel %vm458_vm15, %v2556_v22, %v2531_v29 }
 0x318   : > { %v3304_v41 = vpop.permute.xlu0 %2563  ;;  %v2367_v0 = vpack.c.bf16 %v850_v34, %v815_v23  ;;  %v2369_v55 = vpack.c.bf16 %v849_v38, %v814_v31  ;;  %v2561_v63 = vunpack.i.h.bf16 %v2559_v32  ;;  %v2560_v3 = vunpack.i.l.bf16 %v2559_v32 }
 0x319   : > { %v2566_v60 = vunpack.i.h.bf16 %v3304_v41 }
 0x31a   : > { %2368 = vmatprep.subr.bf16.mxu1 %v2367_v0  ;;  %932 = vrot.lane.b32.xlu0 %v3162_v35, %s2879_s21  ;;  %v1300_v61 = vsel %vm458_vm15, %v2560_v3, %v2561_v63  ;;  %v1237_v0 = vsel %vm499_vm1, %v3283_v14, %v3285_v18  ;;  %v2565_v63 = vunpack.i.l.bf16 %v3304_v41 }
 0x31b   : > { %928 = vrot.lane.b32.xlu1 %v3203_v51, %s2879_s21  ;;  %2370 = vmatpush1.bf16.msra.mxu1 %v2369_v55  ;;  %v2569_v7 = vpop.permute.xlu1 %2568 }
 0x31c   : > { %v2574_v9 = vpop.permute.xlu0 %2573  ;;  %v2570_v4 = vunpack.i.l.bf16 %v2569_v7  ;;  %v2571_v51 = vunpack.i.h.bf16 %v2569_v7 }
 0x31d   : > { %v2576_v5 = vunpack.i.h.bf16 %v2574_v9  ;;  %v2575_v13 = vunpack.i.l.bf16 %v2574_v9 }
 0x31e   : > { %2653 = vrot.lane.b32.xlu0 %v2652_v17, %s2881_s23  ;;  %v1299_v29 = vsel %vm458_vm15, %v2570_v4, %v2560_v3 }
 0x31f   : > { %1297 = vrot.lane.b32.xlu1 %v3285_v18, %s2881_s23  ;;  %v2579_v20 = vpop.permute.xlu1 %2578  ;;  %v3318_v6 = vsel %vm499_vm1, %v2575_v13, %v2576_v5  ;;  %v1236_v18 = vsel %vm499_vm1, %v3292_v26, %v3283_v14 }
 0x320   : > { %v2581_v35 = vunpack.i.h.bf16 %v2579_v20  ;;  %v2580_v21 = vunpack.i.l.bf16 %v2579_v20  ;;  %v2594_v16 = vpop.permute.xlu0 %2593 }
 0x321   : > { %v2596_v25 = vunpack.i.h.bf16 %v2594_v16  ;;  %v2595_v27 = vunpack.i.l.bf16 %v2594_v16 }
 0x322   : > { %1287 = vrot.lane.b32.xlu0 %v1225_v40, %s2881_s23  ;;  %v3321_v28 = vsel %vm499_vm1, %v2580_v21, %v2581_v35 }
 0x323   : > { %v1301_v22 = vsel %vm458_vm15, %v2571_v51, %v2595_v27  ;;  %2658 = vrot.lane.b32.xlu1 %v3113_v56, %s2876_s18  ;;  %v2584_v30 = vpop.permute.xlu1 %2583  ;;  %v1302_v11 = vsel %vm458_vm15, %v2595_v27, %v2596_v25  ;;  %v2375_v23 = vpack.c.bf16 %v3321_v28, %v3318_v6 }
 0x324   : > { %v2385_v31 = vpack.c.bf16 %v1301_v22, %v1299_v29  ;;  %v2586_v32 = vunpack.i.h.bf16 %v2584_v30  ;;  %v2585_v34 = vunpack.i.l.bf16 %v2584_v30  ;;  %v2383_v38 = vpack.c.bf16 %v1302_v11, %v1300_v61 }
 0x326   : > { %2384 = vmatprep.subr.bf16.mxu0 %v2383_v38  ;;  %1295 = vrot.lane.b32.xlu0 %v1237_v0, %s2881_s23  ;;  %v3335_v55 = vsel %vm499_vm1, %v2585_v34, %v2575_v13  ;;  %v3338_v56 = vsel %vm499_vm1, %v2586_v32, %v2580_v21  ;;  %v876_v13 = vsel %vm487_vm6, %v2565_v63, %v2566_v60 }
 0x327   : > { %2668 = vrot.lane.b32.xlu1 %v3178_v42, %s2881_s23  ;;  %v3342_v58 = vpop.permute.xlu1 %2588  ;;  %2386 = vmatpush1.bf16.msra.mxu0 %v2385_v31  ;;  %v2377_v7 = vpack.c.bf16 %v3338_v56, %v3335_v55 }
 0x328   : > { %v2590_v9 = vunpack.i.l.bf16 %v3342_v58  ;;  %v2591_v11 = vunpack.i.h.bf16 %v3342_v58 }
 0x32a   : > { %1293 = vrot.lane.b32.xlu0 %v1236_v18, %s2881_s23 }
 0x32b   : > { %2678 = vrot.lane.b32.xlu1 %v3136_v12, %s2881_s23  ;;  %v919_v17 = vpop.permute.xlu1 %918 }
 0x32c   : > { %v3356_v42 = vsel %vm499_vm1, %v919_v17, %v2590_v9 }
 0x32e   : > { %2663 = vrot.lane.b32.xlu0 %v3125_v62, %s2881_s23 }
 0x32f   : > { %2688 = vrot.lane.b32.xlu1 %v3213_v54, %s2881_s23  ;;  %v2599_v14 = vpop.permute.xlu1 %2598  ;;  %v1239_v54 = vld [vmem:[%s3655_s5] sm:$0xf] }
 0x330   : > { %v2601_v26 = vunpack.i.h.bf16 %v2599_v14  ;;  %v2600_v3 = vunpack.i.l.bf16 %v2599_v14 }
 0x332   : > { %2673 = vrot.lane.b32.xlu0 %v3152_v24, %s2881_s23  ;;  %v863_v5 = vsel %vm458_vm15, %v2600_v3, %v2601_v26  ;;  %v939_v24 = vld [vmem:[%s3655_s5] sm:$0xf] }
 0x333   : > { %2698 = vrot.lane.b32.xlu1 %v3125_v62, %s2879_s21  ;;  %v2371_v41 = vpack.c.bf16 %v876_v13, %v863_v5  ;;  %v2609_v4 = vpop.permute.xlu1 %2608 }
 0x334   : > { %v2610_v25 = vunpack.i.l.bf16 %v2609_v4  ;;  %v2611_v31 = vunpack.i.h.bf16 %v2609_v4 }
 0x335   : > { %2372 = vmatprep.subr.bf16.mxu1 %v2371_v41 }
 0x336   : > { %2683 = vrot.lane.b32.xlu0 %v3209_v53, %s2881_s23  ;;  %v2604_v53 = vpop.permute.xlu0 %2603  ;;  %v875_v32 = vsel %vm487_vm6, %v2610_v25, %v2565_v63 }
 0x337   : > { %1597 = vrot.lane.b32.xlu1 %v3172_v39, %s2879_s21  ;;  %v2605_v61 = vunpack.i.l.bf16 %v2604_v53 }
 0x33b   : > { %1609 = vrot.lane.b32.xlu1 %v3146_v19, %s2879_s21 }
 0x33f   : > { %942 = vperm.xlu1 %2490, %v939_v24  }
 0x343   : > { %1242 = vperm.xlu1 %2490, %v1239_v54  }
 0x347   : > { %2703 = vrot.lane.b32.xlu1 %v3183_v44, %s2885_s27 }
 0x378   : > { %v2614_v20 = vpop.permute.xlu0 %2613 }
 0x379   : > { %v2616_v34 = vunpack.i.h.bf16 %v2614_v20  ;;  %v2615_v38 = vunpack.i.l.bf16 %v2614_v20 }
 0x37c   : > { %v2619_v35 = vpop.permute.xlu0 %2618  ;;  %v2624_v21 = vpop.permute.xlu1 %2623 }
 0x37d   : > { %v2621_v29 = vunpack.i.h.bf16 %v2619_v35  ;;  %v2625_v22 = vunpack.i.l.bf16 %v2624_v21  ;;  %v2620_v0 = vunpack.i.l.bf16 %v2619_v35  ;;  %v2626_v41 = vunpack.i.h.bf16 %v2624_v21 }
 0x37f   : > { %v1308_v54 = vsel %vm458_vm15, %v2621_v29, %v2615_v38  ;;  %v1310_v4 = vsel %vm458_vm15, %v2616_v34, %v2625_v22  ;;  %v2606_v38 = vunpack.i.h.bf16 %v2604_v53 }
 0x380   : > { %v2629_v16 = vpop.permute.xlu0 %2628  ;;  %v2644_v51 = vpop.permute.xlu1 %2643  ;;  %v2391_v22 = vpack.c.bf16 %v1310_v4, %v1308_v54 }
 0x381   : > { %v2631_v30 = vunpack.i.h.bf16 %v2629_v16  ;;  %v2645_v44 = vunpack.i.l.bf16 %v2644_v51  ;;  %v2630_v18 = vunpack.i.l.bf16 %v2629_v16  ;;  %v2646_v14 = vunpack.i.h.bf16 %v2644_v51 }
 0x383   : > { %v1305_v24 = vsel %vm458_vm15, %v2620_v0, %v2631_v30  ;;  %v1306_v16 = vsel %vm458_vm15, %v2631_v30, %v2645_v44  ;;  %v915_v0 = vsel %vm487_vm6, %v2611_v31, %v2605_v61 }
 0x384   : > { %v3384_v27 = vpop.permute.xlu0 %2633  ;;  %v3386_v40 = vpop.permute.xlu1 %930 }
 0x385   : > { %v2635_v26 = vunpack.i.l.bf16 %v3384_v27  ;;  %v2636_v30 = vunpack.i.h.bf16 %v3384_v27 }
 0x387   : > { %v1309_v21 = vsel %vm458_vm15, %v2635_v26, %v2616_v34 }
 0x388   : > { %v2639_v17 = vpop.permute.xlu0 %2638  ;;  %v2649_v60 = vpop.permute.xlu1 %2648 }
 0x389   : > { %v2641_v5 = vunpack.i.h.bf16 %v2639_v17  ;;  %v2640_v13 = vunpack.i.l.bf16 %v2639_v17  ;;  %v2650_v61 = vunpack.i.l.bf16 %v2649_v60 }
 0x38b   : > { %v1303_v63 = vsel %vm458_vm15, %v2646_v14, %v2641_v5  ;;  %v862_v20 = vsel %vm458_vm15, %v2640_v13, %v2600_v3  ;;  %v1304_v35 = vsel %vm458_vm15, %v2641_v5, %v2630_v18  ;;  %v1307_v14 = vsel %vm458_vm15, %v2626_v41, %v2621_v29  ;;  %v938_v13 = vld [vmem:[%s3654_s4] sm:$0xf] }
 0x38c   : > { %v2389_v51 = vpack.c.bf16 %v1305_v24, %v1303_v63  ;;  %v933_v25 = vpop.permute.xlu0 %932  ;;  %v2373_v50 = vpack.c.bf16 %v875_v32, %v862_v20  ;;  %v2387_v49 = vpack.c.bf16 %v1306_v16, %v1304_v35  ;;  %v925_v3 = vsel %vm499_vm1, %v2590_v9, %v2591_v11  ;;  %v1238_v20 = vld [vmem:[%s3654_s4] sm:$0xf] }
 0x38d   : > { %v929_v17 = vpop.permute.xlu1 %928  ;;  %v2393_v44 = vpack.c.bf16 %v1309_v21, %v1307_v14  ;;  %v2379_v53 = vpack.c.bf16 %v925_v3, %v915_v0  ;;  %v935_v55 = vsel %vm499_vm1, %v3386_v40, %v933_v25 }
 0x38e   : > { %2374 = vmatpush1.bf16.msra.mxu1 %v2373_v50  ;;  %2388 = vmatprep.subr.bf16.mxu0 %v2387_v49  ;;  %v914_v49 = vsel %vm487_vm6, %v2606_v38, %v2611_v31  ;;  %v2651_v50 = vunpack.i.h.bf16 %v2649_v60  ;;  %v934_v24 = vsel %vm499_vm1, %v929_v17, %v3386_v40 }
 0x38f   : > { %2376 = vmatprep.subr.bf16.mxu1 %v2375_v23  ;;  %2390 = vmatpush1.bf16.msra.mxu0 %v2389_v51  ;;  %v2381_v58 = vpack.c.bf16 %v3356_v42, %v914_v49 }
 0x390   : > { %v2654_v32 = vpop.permute.xlu0 %2653  ;;  %2392 = vmatprep.subr.bf16.mxu0 %v2391_v22  ;;  %v1311_v27 = vsel %vm458_vm15, %v2651_v50, %v2636_v30 }
 0x391   : > { %v2656_v29 = vunpack.i.h.bf16 %v2654_v32  ;;  %v2655_v34 = vunpack.i.l.bf16 %v2654_v32  ;;  %v1298_v18 = vpop.permute.xlu1 %1297 }
 0x392   : > { %2378 = vmatpush1.bf16.msra.mxu1 %v2377_v7 }
 0x393   : > { %2380 = vmatprep.subr.bf16.mxu1 %v2379_v53  ;;  %2394 = vmatpush1.bf16.msra.mxu0 %v2393_v44  ;;  %v1312_v6 = vsel %vm458_vm15, %v2636_v30, %v2655_v34  ;;  %v1314_v28 = vsel %vm458_vm15, %v2656_v29, %v2650_v61 }
 0x394   : > { %v1288_v23 = vpop.permute.xlu0 %1287  ;;  %v2395_v9 = vpack.c.bf16 %v1314_v28, %v1312_v6 }
 0x395   : > { %v1313_v11 = vsel %vm458_vm15, %v1288_v23, %v2656_v29  ;;  %v2659_v31 = vpop.permute.xlu1 %2658 }
 0x396   : > { %v2397_v60 = vpack.c.bf16 %v1313_v11, %v1311_v27  ;;  %v2661_v26 = vunpack.i.h.bf16 %v2659_v31  ;;  %v2660_v5 = vunpack.i.l.bf16 %v2659_v31  ;;  %2382 = vmatpush1.bf16.msra.mxu1 %v2381_v58  ;;  %2396 = vmatprep.subr.bf16.mxu0 %v2395_v9 }
 0x397   : > { %965 = vmatprep.subr.mxu1 %v935_v55 }
 0x398   : > { %v1541_v56 = vmul.f32 %v2661_v26, %v3146_v19  ;;  %v1535_v7 = vsel %vm430_vm14, %v2660_v5, %v2661_v26  ;;  %v1296_v42 = vpop.permute.xlu0 %1295  ;;  %2398 = vmatpush1.bf16.msra.mxu0 %v2397_v60  ;;  %v1539_v16 = vmul.f32 %v2660_v5, %v3138_v15 }
 0x399   : > { %v3424_v41 = vpop.permute.xlu1 %2668  ;;  %v1316_v54 = vsel %vm458_vm15, %v1296_v42, %v1298_v18  ;;  %v1540_v4 = vmul.f32 %v1535_v7, %v3131_v2 }
 0x39a   : > { %966 = vmatpush1.msra.mxu1 %v934_v24  ;;  %1354 = vmatprep.subr.mxu0 %v1316_v54  ;;  %v2670_v25 = vunpack.i.l.bf16 %v3424_v41  ;;  %v2671_v23 = vunpack.i.h.bf16 %v3424_v41 }
 0x39b   : > { %2333 = vmatmul.mubr.msk.f32.vlgmr.msra.gmra.mrb[0].mxu1 %vm945_vm8, %v938_v13  ;;  %v2692_v19 = vpack.i.bf16 %v1541_v56, %v1540_v4 }
 0x39c   : > { %v1294_v63 = vpop.permute.xlu0 %1293  ;;  %1113 = vmatprep.mubr.f32.mxu1 %v2872_v1 }
 0x39d   : > { %v1315_v35 = vsel %vm458_vm15, %v1294_v63, %v1296_v42  ;;  %2693 = vrot.lane.b32.xlu0 %v2692_v19, %s2885_s27  ;;  %v2679_v40 = vpop.permute.xlu1 %2678 }
 0x39e   : > { %1355 = vmatpush1.msra.mxu0 %v1315_v35  ;;  %v2681_v14 = vunpack.i.h.bf16 %v2679_v40  ;;  %v2680_v3 = vunpack.i.l.bf16 %v2679_v40 }
 0x39f   : > { %2337 = vmatmul.mubr.msk.f32.vlgmr.msra.gmra.mrb[8].mxu0 %vm945_vm8, %v1238_v20 }
 0x3a0   : > { %v2664_v51 = vpop.permute.xlu0 %2663  ;;  %1882 = vmatprep.mubr.f32.mxu0 %v2872_v1  ;;  %v1574_v44 = vsel %vm458_vm15, %v2680_v3, %v2681_v14 }
 0x3a1   : > { %v2665_v21 = vunpack.i.l.bf16 %v2664_v51  ;;  %1589 = vrot.lane.b32.xlu0 %v1539_v16, %s2885_s27  ;;  %v2689_v38 = vpop.permute.xlu1 %2688  ;;  %v2732_v50 = vpack.i.bf16 %v2681_v14, %v1574_v44  ;;  %v2666_v61 = vunpack.i.h.bf16 %v2664_v51 }
 0x3a2   : > { %v2690_v49 = vunpack.i.l.bf16 %v2689_v38 }
 0x3a3   : > { %v1551_v17 = vsel %vm458_vm15, %v2670_v25, %v2665_v21  ;;  %v1552_v37 = vsel %vm458_vm15, %v2665_v21, %v2666_v61  ;;  %v3660_v25 = vpack.i.bf16 %v3186_v45, %v3188_v46  ;;  %v3661_v21 = vpack.i.bf16 %v3195_v48, %v3191_v47 }
 0x3a4   : > { %v2712_v0 = vpack.i.bf16 %v1551_v17, %v3260_v59  ;;  %v2674_v22 = vpop.permute.xlu0 %2673  ;;  %v1022_v59 = vld [vmem:[%s3656_s6] sm:$0xf]  ;;  %v1573_v36 = vsel %vm458_vm15, %v2690_v49, %v2680_v3  ;;  %v2707_v58 = vpack.i.bf16 %v2666_v61, %v1552_v37 }
 0x3a5   : > { %1607 = vrot.lane.b32.xlu0 %v3131_v2, %s2879_s21  ;;  %v2699_v53 = vpop.permute.xlu1 %2698  ;;  %v2691_v2 = vunpack.i.h.bf16 %v2689_v38  ;;  %v2676_v9 = vunpack.i.h.bf16 %v2674_v22 }
 0x3a6   : > { %2713 = vrot.lane.b32.xlu1 %v2712_v0, %s2885_s27  ;;  %v2701_v29 = vunpack.i.h.bf16 %v2699_v53  ;;  %v2700_v34 = vunpack.i.l.bf16 %v2699_v53 }
 0x3a7   : > { %v1562_v60 = vsel %vm458_vm15, %v2676_v9, %v2671_v23 }
 0x3a8   : > { %v2684_v30 = vpop.permute.xlu0 %2683  ;;  %v1604_v28 = vsel %vm499_vm1, %v2700_v34, %v2701_v29  ;;  %v2727_v5 = vpack.i.bf16 %v3244_v10, %v1562_v60 }
 0x3a9   : > { %v2685_v32 = vunpack.i.l.bf16 %v2684_v30  ;;  %1605 = vrot.lane.b32.xlu0 %v3138_v15, %s2879_s21  ;;  %v1411_v15 = vld [vmem:[%s3656_s6] sm:$0xf]  ;;  %v2752_v11 = vpack.i.bf16 %v2701_v29, %v1604_v28  ;;  %v2686_v26 = vunpack.i.h.bf16 %v2684_v30  ;;  %v1598_v41 = vpop.permute.xlu1 %1597 }
 0x3aa   : > { %2723 = vrot.lane.b32.xlu1 %v2722_v43, %s2885_s27  ;;  %v2675_v43 = vunpack.i.l.bf16 %v2674_v22  ;;  %v1603_v10 = vsel %vm499_vm1, %v1598_v41, %v2700_v34 }
 0x3ab   : > { %v1584_v18 = vsel %vm458_vm15, %v2691_v2, %v2685_v32  ;;  %v1585_v55 = vsel %vm458_vm15, %v2685_v32, %v2686_v26 }
 0x3ac   : > { %v2747_v6 = vpack.i.bf16 %v1584_v18, %v1573_v36  ;;  %v1563_v27 = vsel %vm458_vm15, %v2671_v23, %v2675_v43  ;;  %v2737_v56 = vpack.i.bf16 %v2686_v26, %v1585_v55 }
 0x3ad   : > { %1025 = vperm.xlu0 %2491, %v1022_v59   ;;  %v2717_v31 = vpack.i.bf16 %v2675_v43, %v1563_v27  ;;  %v1610_v63 = vpop.permute.xlu1 %1609  ;;  %v3507_v43 = vld [vmem:[%s3657_s7] sm:$0xff] }
 0x3ae   : > { %2733 = vrot.lane.b32.xlu1 %v2732_v50, %s2885_s27 }
 0x3b1   : > { %1414 = vperm.xlu0 %2491, %v1411_v15  }
 0x3b2   : > { %2748 = vrot.lane.b32.xlu1 %v2747_v6, %s2885_s27 }
 0x3b5   : > { %2708 = vrot.lane.b32.xlu0 %v2707_v58, %s2885_s27 }
 0x3b6   : > { %2753 = vrot.lane.b32.xlu1 %v2752_v11, %s2885_s27 }
 0x3b9   : > { %2718 = vrot.lane.b32.xlu0 %v2717_v31, %s2885_s27 }
 0x3bd   : > { %2728 = vrot.lane.b32.xlu0 %v2727_v5, %s2885_s27 }
 0x3c1   : > { %2738 = vrot.lane.b32.xlu0 %v2737_v56, %s2885_s27 }
 0x40f   : > { %v2694_v7 = vpop.permute.xlu0 %2693 }
 0x410   : > { %v2696_v42 = vunpack.i.h.bf16 %v2694_v7  ;;  %v2695_v13 = vunpack.i.l.bf16 %v2694_v7 }
 0x412   : > { %v1596_v24 = vsel %vm487_vm6, %v2695_v13, %v2696_v42 }
 0x413   : > { %v2742_v54 = vpack.i.bf16 %v2696_v42, %v1596_v24  ;;  %v1590_v4 = vpop.permute.xlu0 %1589 }
 0x414   : > { %v1595_v19 = vsel %vm487_vm6, %v1590_v4, %v2695_v13 }
 0x415   : > { %2743 = vrot.lane.b32.xlu0 %v2742_v54, %s2885_s27  ;;  %v2757_v20 = vpack.i.bf16 %v1603_v10, %v1595_v19 }
 0x417   : > { %v1608_v35 = vpop.permute.xlu0 %1607 }
 0x418   : > { %v1612_v40 = vsel %vm499_vm1, %v1608_v35, %v1610_v63 }
 0x419   : > { %1676 = vrot.lane.b32.xlu1 %v1612_v40, %s2885_s27  ;;  %2758 = vrot.lane.b32.xlu0 %v2757_v20, %s2885_s27 }
 0x41b   : > { %v1606_v16 = vpop.permute.xlu0 %1605 }
 0x41c   : > { %v1611_v51 = vsel %vm499_vm1, %v1606_v16, %v1608_v35 }
 0x41d   : > { %1674 = vrot.lane.b32.xlu1 %v1611_v51, %s2885_s27  ;;  %1678 = vrot.lane.b32.xlu0 %v1610_v63, %s2885_s27 }
 0x421   : > { %2768 = vrot.lane.b32.xlu1 %v3158_v33, %s2881_s23  ;;  %2763 = vrot.lane.b32.xlu0 %v3104_v52, %s2878_s20  ;;  %v943_v33 = vpop.permute.xlu1 %942  ;;  %s3631_s20 = scalar_lea.vmem %s3659_s9, %s2358_s26 }
 0x425   : > { %2778 = vrot.lane.b32.xlu1 %v3660_v25, %s2881_s23  ;;  %2773 = vrot.lane.b32.xlu0 %v3661_v21, %s2881_s23  ;;  %v1243_v0 = vpop.permute.xlu1 %1242 }
 0x429   : > { %2788 = vrot.lane.b32.xlu1 %v3237_v8, %s2885_s27  ;;  %2783 = vrot.lane.b32.xlu0 %v3125_v62, %s2885_s27  ;;  %v2704_v46 = vpop.permute.xlu1 %2703 }
 0x42a   : > { %v2706_v44 = vunpack.i.h.bf16 %v2704_v46  ;;  %v2705_v32 = vunpack.i.l.bf16 %v2704_v46 }
 0x42c   : > { %v1026_v52 = vpop.permute.xlu0 %1025  ;;  %v1681_v5 = vsel %vm487_vm6, %v2705_v32, %v2706_v44 }
 0x42d   : > { %2793 = vrot.lane.b32.xlu0 %v3248_v57, %s2885_s27  ;;  %v2714_v38 = vpop.permute.xlu1 %2713 }
 0x42e   : > { %v2716_v49 = vunpack.i.h.bf16 %v2714_v38  ;;  %v2715_v50 = vunpack.i.l.bf16 %v2714_v38 }
 0x430   : > { %v1415_v17 = vpop.permute.xlu0 %1414  ;;  %v1680_v13 = vsel %vm487_vm6, %v2715_v50, %v2705_v32 }
 0x431   : > { %v2724_v14 = vpop.permute.xlu1 %2723 }
 0x432   : > { %v2726_v6 = vunpack.i.h.bf16 %v2724_v14  ;;  %v2725_v28 = vunpack.i.l.bf16 %v2724_v14 }
 0x434   : > { %v2709_v45 = vpop.permute.xlu0 %2708  ;;  %v1687_v63 = vsel %vm487_vm6, %v2725_v28, %v2726_v6 }
 0x435   : > { %v2711_v62 = vunpack.i.h.bf16 %v2709_v45  ;;  %v2710_v59 = vunpack.i.l.bf16 %v2709_v45  ;;  %v2734_v34 = vpop.permute.xlu1 %2733 }
 0x436   : > { %v2736_v54 = vunpack.i.h.bf16 %v2734_v34  ;;  %v2735_v4 = vunpack.i.l.bf16 %v2734_v34  ;;  %v1613_v34 = vld [vmem:[%s3654_s4] sm:$0xf] }
 0x437   : > { %v1683_v11 = vsel %vm487_vm6, %v2710_v59, %v2711_v62  ;;  %v1682_v31 = vsel %vm487_vm6, %v2716_v49, %v2710_v59 }
 0x438   : > { %v2719_v22 = vpop.permute.xlu0 %2718  ;;  %v2399_v24 = vpack.c.bf16 %v1683_v11, %v1681_v5  ;;  %v2401_v10 = vpack.c.bf16 %v1682_v31, %v1680_v13 }
 0x439   : > { %v2721_v18 = vunpack.i.h.bf16 %v2719_v22  ;;  %v2720_v15 = vunpack.i.l.bf16 %v2719_v22  ;;  %v2749_v19 = vpop.permute.xlu1 %2748 }
 0x43a   : > { %v2751_v51 = vunpack.i.h.bf16 %v2749_v19  ;;  %v2750_v25 = vunpack.i.l.bf16 %v2749_v19 }
 0x43b   : > { %v1685_v42 = vsel %vm487_vm6, %v2720_v15, %v2721_v18 }
 0x43c   : > { %v2729_v48 = vpop.permute.xlu0 %2728  ;;  %v2403_v40 = vpack.c.bf16 %v1687_v63, %v1685_v42  ;;  %v2860_v42 = vld [vmem:[#allocation3] sm:$0xff] }
 0x43d   : > { %v2731_v60 = vunpack.i.h.bf16 %v2729_v48  ;;  %v2730_v26 = vunpack.i.l.bf16 %v2729_v48  ;;  %v2754_v46 = vpop.permute.xlu1 %2753 }
 0x43e   : > { %v2756_v38 = vunpack.i.h.bf16 %v2754_v46  ;;  %v2755_v22 = vunpack.i.l.bf16 %v2754_v46 }
 0x43f   : > { %v1686_v20 = vsel %vm487_vm6, %v2731_v60, %v2725_v28  ;;  %v1684_v35 = vsel %vm487_vm6, %v2730_v26, %v2720_v15  ;;  %v1792_v60 = vld [vmem:[%s3656_s6] sm:$0xf] }
 0x440   : > { %v2739_v23 = vpop.permute.xlu0 %2738  ;;  %v2405_v21 = vpack.c.bf16 %v1686_v20, %v1684_v35  ;;  %v1907_v35 = vld [vmem:[#allocation3 + $0x50] sm:$0xff] }
 0x441   : > { %v2741_v55 = vunpack.i.h.bf16 %v2739_v23  ;;  %v2740_v56 = vunpack.i.l.bf16 %v2739_v23  ;;  %v2858_v23 = vld [vmem:[#allocation3 + $0x8] sm:$0xff] }
 0x443   : > { %v1691_v16 = vsel %vm487_vm6, %v2740_v56, %v2741_v55 }
 0x46e   : > { %v1015_v47 = vpop.f32.mrb[0].mxu1 }
 0x46f   : > { %v1016_v3 = vadd.f32 %v1015_v47, %v943_v33  ;;  %v1017_v30 = vpop.f32.mrb[1].mxu1 }
 0x470   : > { %v1018_v8 = vadd.f32 %v1017_v30, %v943_v33  ;;  %v1690_v33 = vsel %vm487_vm6, %v2751_v51, %v2740_v56  ;;  %v1695_v30 = vsel %vm487_vm6, %v2755_v22, %v2756_v38 }
 0x471   : > { %v1028_v53 = vmul.f32 %v1026_v52, %v1016_v3  ;;  %vm1020_vm11 = vcmp.gt.f32.partialorder %v1016_v3, 0.0 }
 0x472   : > { %vm1021_vm12 = vcmp.gt.f32.partialorder %v1018_v8, 0.0  ;;  %v1029_v57 = vmul.f32 %v1026_v52, %v1018_v8  ;;  %v1404_v2 = vpop.f32.mrb[8].mxu0  ;;  %v1689_v52 = vsel %vm487_vm6, %v2735_v4, %v2736_v54 }
 0x473   : > { %v1405_v61 = vadd.f32 %v1404_v2, %v1243_v0  ;;  %v1406_v29 = vpop.f32.mrb[9].mxu0  ;;  %v1030_v58 = vsel %vm1020_vm11, %v1016_v3, %v1028_v53 }
 0x474   : > { %v1407_v36 = vadd.f32 %v1406_v29, %v1243_v0  ;;  %v1031_v37 = vsel %vm1021_vm12, %v1018_v8, %v1029_v57  ;;  %v1688_v0 = vsel %vm487_vm6, %v2750_v25, %v2735_v4 }
 0x475   : > { %v1417_v9 = vmul.f32 %v1415_v17, %v1405_v61  ;;  %2334 = vmatprep.subr.msk.mxu1 %vm556_vm4, %v1031_v37  ;;  %vm1409_vm14 = vcmp.gt.f32.partialorder %v1405_v61, 0.0  ;;  %v2409_v45 = vpack.c.bf16 %v1690_v33, %v1688_v0  ;;  %v2857_v37 = vld [vmem:[#allocation3 + $0x10] sm:$0xff] }
 0x476   : > { %vm1410_vm7 = vcmp.gt.f32.partialorder %v1407_v36, 0.0  ;;  %v1418_v27 = vmul.f32 %v1415_v17, %v1407_v36  ;;  %2335 = vmatpush1.msk.msra.mxu1 %vm556_vm4, %v1030_v58  ;;  %v2407_v17 = vpack.c.bf16 %v1691_v16, %v1689_v52  ;;  %v2797_v31 = vpack.i.bf16 %v2857_v37, %v2858_v23  ;;  %v2863_v33 = vld [vmem:[#allocation3 + $0x30] sm:$0xff] }
 0x477   : > { %2336 = vmatmul.mubr.msk.f32.vlgmr.msra.gmra.mrb[2].mxu1 %vm1039_vm13, %v3507_v43  ;;  %v1419_v41 = vsel %vm1409_vm14, %v1405_v61, %v1417_v9  ;;  %v1614_v9 = vld [vmem:[%s3655_s5] sm:$0xf] }
 0x478   : > { %v1420_v7 = vsel %vm1410_vm7, %v1407_v36, %v1418_v27  ;;  %1501 = vmatprep.mubr.f32.mxu1 %v2872_v1 }
 0x479   : > { %2338 = vmatprep.subr.msk.mxu1 %vm556_vm4, %v1420_v7  ;;  %v2859_v7 = vld [vmem:[#allocation3 + $0x18] sm:$0xff] }
 0x47a   : > { %2339 = vmatpush1.msk.msra.mxu1 %vm556_vm4, %v1419_v41  ;;  %v2807_v13 = vpack.i.bf16 %v2859_v7, %v2860_v42  ;;  %v2862_v41 = vld [vmem:[#allocation3 + $0x28] sm:$0xff] }
 0x47b   : > { %2400 = vmatprep.subr.bf16.mxu1 %v2399_v24  ;;  %2340 = vmatmul.mubr.msk.f32.vlgmr.msra.gmra.mrb[4].mxu1 %vm1039_vm13, %v3507_v43 }
 0x47c   : > { %2402 = vmatpush1.bf16.msra.mxu1 %v2401_v10  ;;  %1783 = vmatprep.mubr.f32.mxu1 %v2872_v1 }
 0x47d   : > { %2404 = vmatprep.subr.bf16.mxu1 %v2403_v40  ;;  %v1908_v40 = vld [vmem:[#allocation3 + $0x58] sm:$0xff] }
 0x480   : > { %2406 = vmatpush1.bf16.msra.mxu1 %v2405_v21  ;;  %v2827_v21 = vpack.i.bf16 %v1908_v40, %v1907_v35 }
 0x481   : > { %2408 = vmatprep.subr.bf16.mxu1 %v2407_v17 }
 0x484   : > { %2410 = vmatpush1.bf16.msra.mxu1 %v2409_v45 }
 0x487   : > { %v2744_v14 = vpop.permute.xlu0 %2743 }
 0x488   : > { %v2746_v47 = vunpack.i.h.bf16 %v2744_v14  ;;  %v2745_v48 = vunpack.i.l.bf16 %v2744_v14  ;;  %v1906_v14 = vld [vmem:[#allocation3 + $0x48] sm:$0xff] }
 0x48a   : > { %v1693_v3 = vsel %vm487_vm6, %v2745_v48, %v2746_v47 }
 0x48b   : > { %v1677_v8 = vpop.permute.xlu1 %1676  ;;  %v2759_v44 = vpop.permute.xlu0 %2758  ;;  %v2411_v32 = vpack.c.bf16 %v1695_v30, %v1693_v3 }
 0x48c   : > { %v2761_v62 = vunpack.i.h.bf16 %v2759_v44  ;;  %v2760_v53 = vunpack.i.l.bf16 %v2759_v44 }
 0x48d   : > { %2412 = vmatprep.subr.bf16.mxu1 %v2411_v32 }
 0x48e   : > { %v1694_v59 = vsel %vm487_vm6, %v2761_v62, %v2755_v22  ;;  %v1692_v57 = vsel %vm487_vm6, %v2760_v53, %v2745_v48 }
 0x48f   : > { %v2413_v2 = vpack.c.bf16 %v1694_v59, %v1692_v57  ;;  %v1679_v49 = vpop.permute.xlu0 %1678  ;;  %v1675_v61 = vpop.permute.xlu1 %1674 }
 0x490   : > { %v1697_v50 = vsel %vm487_vm6, %v1677_v8, %v1679_v49  ;;  %v1696_v18 = vsel %vm487_vm6, %v1675_v61, %v1677_v8  ;;  %v1979_v61 = vld [vmem:[%s3655_s5] sm:$0xf] }
 0x491   : > { %2414 = vmatpush1.bf16.msra.mxu1 %v2413_v2 }
 0x492   : > { %1735 = vmatprep.subr.mxu1 %v1697_v50 }
 0x493   : > { %v2764_v29 = vpop.permute.xlu0 %2763  ;;  %v2769_v11 = vpop.permute.xlu1 %2768 }
 0x494   : > { %v2766_v15 = vunpack.i.h.bf16 %v2764_v29  ;;  %v2765_v36 = vunpack.i.l.bf16 %v2764_v29  ;;  %v2771_v26 = vunpack.i.h.bf16 %v2769_v11  ;;  %v2770_v5 = vunpack.i.l.bf16 %v2769_v11 }
 0x495   : > { %1736 = vmatpush1.msra.mxu1 %v1696_v18  ;;  %v1033_v18 = vld [vmem:[%s3658_s8] sm:$0xff] }
 0x496   : > { %v1922_v6 = vmul.f32 %v2857_v37, %v2766_v15  ;;  %v1916_v28 = vsel %vm439_vm3, %v2765_v36, %v2766_v15  ;;  %2343 = vmatmul.mubr.msk.f32.vlgmr.msra.gmra.mrb[6].mxu1 %vm945_vm8, %v1613_v34  ;;  %v1920_v27 = vmul.f32 %v2765_v36, %v3172_v39  ;;  %v2861_v39 = vld [vmem:[#allocation3 + $0x20] sm:$0xff]  ;;  %v1933_v54 = vsel %vm458_vm15, %v2770_v5, %v2771_v26  ;;  %v2157_v15 = vld [vmem:[%s3656_s6] sm:$0xf] }
 0x497   : > { %v1921_v58 = vmul.f32 %v2858_v23, %v1916_v28  ;;  %2247 = vmatprep.mubr.f32.mxu1 %v2872_v1  ;;  %v2774_v55 = vpop.permute.xlu0 %2773  ;;  %v2779_v56 = vpop.permute.xlu1 %2778  ;;  %v2802_v24 = vpack.i.bf16 %v2862_v41, %v2861_v39  ;;  %v2812_v19 = vpack.i.bf16 %v2771_v26, %v1933_v54 }
 0x498   : > { %1974 = vrot.lane.b32.xlu0 %v1922_v6, %s2879_s21  ;;  %v2775_v4 = vunpack.i.l.bf16 %v2774_v55  ;;  %v2781_v10 = vunpack.i.h.bf16 %v2779_v56  ;;  %v2776_v63 = vunpack.i.h.bf16 %v2774_v55  ;;  %v2780_v16 = vunpack.i.l.bf16 %v2779_v56 }
 0x499   : > { %1972 = vrot.lane.b32.xlu1 %v1921_v58, %s2879_s21 }
 0x49a   : > { %v1932_v51 = vsel %vm458_vm15, %v2775_v4, %v2770_v5  ;;  %v1943_v52 = vsel %vm458_vm15, %v2781_v10, %v2776_v63  ;;  %v1944_v46 = vsel %vm458_vm15, %v2776_v63, %v2780_v16 }
 0x49b   : > { %v2784_v20 = vpop.permute.xlu0 %2783  ;;  %v2789_v25 = vpop.permute.xlu1 %2788  ;;  %v2822_v17 = vpack.i.bf16 %v2863_v33, %v1932_v51  ;;  %v2832_v48 = vpack.i.bf16 %v2780_v16, %v1944_v46 }
 0x49c   : > { %1617 = vperm.xlu0 %2491, %v1614_v9   ;;  %v2791_v0 = vunpack.i.h.bf16 %v2789_v25  ;;  %v2790_v45 = vunpack.i.l.bf16 %v2789_v25  ;;  %v2786_v38 = vunpack.i.h.bf16 %v2784_v20  ;;  %v2785_v22 = vunpack.i.l.bf16 %v2784_v20 }
 0x49d   : > { %1970 = vrot.lane.b32.xlu1 %v1920_v27, %s2879_s21 }
 0x49e   : > { %v1966_v3 = vsel %vm487_vm6, %v2790_v45, %v2791_v0  ;;  %v1955_v30 = vsel %vm487_vm6, %v2785_v22, %v2786_v38 }
 0x49f   : > { %v2794_v47 = vpop.permute.xlu0 %2793  ;;  %v2847_v32 = vpack.i.bf16 %v2791_v0, %v1966_v3  ;;  %v2842_v62 = vpack.i.bf16 %v2786_v38, %v1955_v30 }
 0x4a0   : > { %2798 = vrot.lane.b32.xlu0 %v2797_v31, %s2879_s21  ;;  %v2796_v8 = vunpack.i.h.bf16 %v2794_v47  ;;  %v2795_v44 = vunpack.i.l.bf16 %v2794_v47 }
 0x4a1   : > { %1795 = vperm.xlu1 %2490, %v1792_v60  }
 0x4a2   : > { %v1965_v53 = vsel %vm487_vm6, %v2796_v8, %v2790_v45  ;;  %v1954_v59 = vsel %vm487_vm6, %v2795_v44, %v2785_v22 }
 0x4a3   : > { %v2852_v57 = vpack.i.bf16 %v1965_v53, %v1954_v59 }
 0x4a4   : > { %2808 = vrot.lane.b32.xlu0 %v2807_v13, %s2879_s21 }
 0x4a5   : > { %2803 = vrot.lane.b32.xlu1 %v2802_v24, %s2879_s21 }
 0x4a8   : > { %2818 = vrot.lane.b32.xlu0 %v3136_v12, %s2879_s21  ;;  %v2837_v12 = vpack.i.bf16 %v1943_v52, %v1906_v14 }
 0x4a9   : > { %2813 = vrot.lane.b32.xlu1 %v2812_v19, %s2879_s21 }
 0x4ac   : > { %2828 = vrot.lane.b32.xlu0 %v2827_v21, %s2879_s21 }
 0x4ad   : > { %2823 = vrot.lane.b32.xlu1 %v2822_v17, %s2879_s21 }
 0x4b0   : > { %2838 = vrot.lane.b32.xlu0 %v2837_v12, %s2879_s21 }
 0x4b1   : > { %2833 = vrot.lane.b32.xlu1 %v2832_v48, %s2879_s21 }
 0x4b4   : > { %2848 = vrot.lane.b32.xlu0 %v2847_v32, %s2879_s21 }
 0x4b5   : > { %2843 = vrot.lane.b32.xlu1 %v2842_v62, %s2879_s21 }
 0x4b9   : > { %2853 = vrot.lane.b32.xlu1 %v2852_v57, %s2879_s21 }
 0x50a   : > { %v1975_v2 = vpop.permute.xlu0 %1974 }
 0x50b   : > { %2043 = vrot.lane.b32.xlu1 %v1975_v2, %s2879_s21  ;;  %v1973_v49 = vpop.permute.xlu1 %1972 }
 0x50c   : > { %v1977_v50 = vsel %vm499_vm1, %v1973_v49, %v1975_v2 }
 0x50d   : > { %2041 = vrot.lane.b32.xlu0 %v1977_v50, %s2879_s21 }
 0x50f   : > { %1982 = vperm.xlu1 %2490, %v1979_v61   ;;  %v1971_v29 = vpop.permute.xlu1 %1970 }
 0x510   : > { %v1976_v34 = vsel %vm499_vm1, %v1971_v29, %v1973_v49 }
 0x511   : > { %2039 = vrot.lane.b32.xlu0 %v1976_v34, %s2879_s21 }
 0x513   : > { %1036 = vperm.xlu1 %2490, %v1033_v18  }
 0x515   : > { %2160 = vperm.xlu0 %2491, %v2157_v15  }
 0x517   : > { %1806 = vperm.xlu1 %2490, %v1033_v18  }
 0x519   : > { %1425 = vperm.xlu0 %2491, %v1033_v18  }
 0x51b   : > { %v1618_v6 = vpop.permute.xlu0 %1617 }
 0x51d   : > { %2171 = vperm.xlu0 %2491, %v1033_v18  }
 0x51f   : > { %v2799_v9 = vpop.permute.xlu0 %2798 }
 0x520   : > { %v1796_v23 = vpop.permute.xlu1 %1795  ;;  %v2800_v24 = vunpack.i.l.bf16 %v2799_v9  ;;  %v2801_v35 = vunpack.i.h.bf16 %v2799_v9 }
 0x522   : > { %v2046_v47 = vsel %vm499_vm1, %v2800_v24, %v2801_v35 }
 0x523   : > { %v2809_v11 = vpop.permute.xlu0 %2808 }
 0x524   : > { %v2804_v27 = vpop.permute.xlu1 %2803  ;;  %v2811_v55 = vunpack.i.h.bf16 %v2809_v11  ;;  %v2810_v56 = vunpack.i.l.bf16 %v2809_v11 }
 0x525   : > { %v2806_v42 = vunpack.i.h.bf16 %v2804_v27  ;;  %v2805_v13 = vunpack.i.l.bf16 %v2804_v27 }
 0x526   : > { %v2045_v40 = vsel %vm499_vm1, %v2810_v56, %v2800_v24 }
 0x527   : > { %v2819_v60 = vpop.permute.xlu0 %2818  ;;  %v2047_v51 = vsel %vm499_vm1, %v2811_v55, %v2805_v13  ;;  %v2048_v21 = vsel %vm499_vm1, %v2805_v13, %v2806_v42 }
 0x528   : > { %v2814_v31 = vpop.permute.xlu1 %2813  ;;  %v2821_v39 = vunpack.i.h.bf16 %v2819_v60  ;;  %v2820_v41 = vunpack.i.l.bf16 %v2819_v60  ;;  %v2417_v12 = vpack.c.bf16 %v2047_v51, %v2045_v40  ;;  %v2415_v30 = vpack.c.bf16 %v2048_v21, %v2046_v47 }
 0x529   : > { %v2816_v54 = vunpack.i.h.bf16 %v2814_v31  ;;  %v2815_v4 = vunpack.i.l.bf16 %v2814_v31 }
 0x52a   : > { %v2052_v52 = vsel %vm499_vm1, %v2820_v41, %v2821_v39 }
 0x52b   : > { %v2829_v5 = vpop.permute.xlu0 %2828  ;;  %v2050_v0 = vsel %vm499_vm1, %v2815_v4, %v2816_v54 }
 0x52c   : > { %v2824_v26 = vpop.permute.xlu1 %2823  ;;  %v2831_v8 = vunpack.i.h.bf16 %v2829_v5  ;;  %v2830_v44 = vunpack.i.l.bf16 %v2829_v5  ;;  %v2419_v62 = vpack.c.bf16 %v2052_v52, %v2050_v0 }
 0x52d   : > { %v2826_v45 = vunpack.i.h.bf16 %v2824_v26  ;;  %v2825_v46 = vunpack.i.l.bf16 %v2824_v26 }
 0x52f   : > { %v2839_v10 = vpop.permute.xlu0 %2838  ;;  %v2051_v53 = vsel %vm499_vm1, %v2826_v45, %v2820_v41  ;;  %v2049_v59 = vsel %vm499_vm1, %v2825_v46, %v2815_v4  ;;  %v1978_v41 = vld [vmem:[%s3654_s4] sm:$0xf] }
 0x530   : > { %v2834_v7 = vpop.permute.xlu1 %2833  ;;  %v2840_v32 = vunpack.i.l.bf16 %v2839_v10  ;;  %v2841_v57 = vunpack.i.h.bf16 %v2839_v10  ;;  %v2421_v18 = vpack.c.bf16 %v2051_v53, %v2049_v59 }
 0x531   : > { %v2836_v38 = vunpack.i.h.bf16 %v2834_v7  ;;  %v2835_v22 = vunpack.i.l.bf16 %v2834_v7 }
 0x532   : > { %v2053_v15 = vsel %vm499_vm1, %v2840_v32, %v2830_v44 }
 0x533   : > { %v2849_v48 = vpop.permute.xlu0 %2848  ;;  %v2056_v2 = vsel %vm499_vm1, %v2835_v22, %v2836_v38 }
 0x534   : > { %v2844_v33 = vpop.permute.xlu1 %2843  ;;  %v2851_v49 = vunpack.i.h.bf16 %v2849_v48  ;;  %v2850_v50 = vunpack.i.l.bf16 %v2849_v48 }
 0x535   : > { %v2846_v61 = vunpack.i.h.bf16 %v2844_v33  ;;  %v2845_v29 = vunpack.i.l.bf16 %v2844_v33 }
 0x536   : > { %v2060_v60 = vsel %vm499_vm1, %v2850_v50, %v2851_v49 }
 0x537   : > { %v2058_v31 = vsel %vm499_vm1, %v2845_v29, %v2846_v61 }
 0x538   : > { %v2854_v34 = vpop.permute.xlu1 %2853  ;;  %v2427_v55 = vpack.c.bf16 %v2060_v60, %v2058_v31 }
 0x539   : > { %v2856_v9 = vunpack.i.h.bf16 %v2854_v34  ;;  %v2855_v27 = vunpack.i.l.bf16 %v2854_v34 }
 0x53b   : > { %v2057_v5 = vsel %vm499_vm1, %v2855_v27, %v2845_v29 }
 0x54a   : > { %v3590_v36 = vpop.f32.mrb[2].mxu1 }
 0x54b   : > { %v3592_v37 = vpop.f32.mrb[3].mxu1 }
 0x54e   : > { %v3594_v28 = vpop.f32.mrb[4].mxu1 }
 0x54f   : > { %v3596_v58 = vpop.f32.mrb[5].mxu1 }
 0x569   : > { %v1785_v19 = vpop.f32.mrb[6].mxu1 }
 0x56a   : > { %v1786_v63 = vadd.f32 %v1785_v19, %v1618_v6  ;;  %v1787_v20 = vpop.f32.mrb[7].mxu1 }
 0x56b   : > { %v1788_v16 = vadd.f32 %v1787_v20, %v1618_v6  ;;  %v2054_v6 = vsel %vm499_vm1, %v2830_v44, %v2831_v8 }
 0x56c   : > { %v1798_v25 = vmul.f32 %v1796_v23, %v1786_v63  ;;  %vm1790_vm3 = vcmp.gt.f32.partialorder %v1786_v63, 0.0  ;;  %v2423_v11 = vpack.c.bf16 %v2056_v2, %v2054_v6 }
 0x56d   : > { %vm1791_vm15 = vcmp.gt.f32.partialorder %v1788_v16, 0.0  ;;  %v1799_v17 = vmul.f32 %v1796_v23, %v1788_v16  ;;  %v2055_v23 = vsel %vm499_vm1, %v2841_v57, %v2835_v22 }
 0x56e   : > { %v1800_v3 = vsel %vm1790_vm3, %v1786_v63, %v1798_v25  ;;  %v2425_v26 = vpack.c.bf16 %v2055_v23, %v2053_v15 }
 0x56f   : > { %v1801_v14 = vsel %vm1791_vm15, %v1788_v16, %v1799_v17 }
 0x570   : > { %2344 = vmatprep.subr.msk.mxu0 %vm556_vm4, %v1801_v14 }
 0x571   : > { %2345 = vmatpush1.msk.msra.mxu0 %vm556_vm4, %v1800_v3 }
 0x572   : > { %2346 = vmatmul.mubr.msk.f32.vlgmr.msra.gmra.mrb[10].mxu0 %vm1039_vm13, %v3507_v43  ;;  %2416 = vmatprep.subr.bf16.mxu0 %v2415_v30 }
 0x573   : > { %2418 = vmatpush1.bf16.msra.mxu0 %v2417_v12  ;;  %2148 = vmatprep.mubr.f32.mxu0 %v2872_v1  ;;  %v2059_v1 = vsel %vm499_vm1, %v2856_v9, %v2850_v50 }
 0x574   : > { %2420 = vmatprep.subr.bf16.mxu0 %v2419_v62  ;;  %v2429_v56 = vpack.c.bf16 %v2059_v1, %v2057_v5 }
 0x577   : > { %2422 = vmatpush1.bf16.msra.mxu0 %v2421_v18 }
 0x578   : > { %2424 = vmatprep.subr.bf16.mxu0 %v2423_v11 }
 0x57b   : > { %2426 = vmatpush1.bf16.msra.mxu0 %v2425_v26 }
 0x57c   : > { %2428 = vmatprep.subr.bf16.mxu0 %v2427_v55 }
 0x57d   : > { %v2044_v7 = vpop.permute.xlu1 %2043 }
 0x57f   : > { %v2042_v42 = vpop.permute.xlu0 %2041  ;;  %2430 = vmatpush1.bf16.msra.mxu0 %v2429_v56 }
 0x580   : > { %v2062_v13 = vsel %vm499_vm1, %v2042_v42, %v2044_v7 }
 0x581   : > { %2100 = vmatprep.subr.mxu0 %v2062_v13 }
 0x583   : > { %v2040_v39 = vpop.permute.xlu0 %2039 }
 0x584   : > { %v2061_v24 = vsel %vm499_vm1, %v2040_v39, %v2042_v42 }
 0x585   : > { %2101 = vmatpush1.msra.mxu0 %v2061_v24 }
 0x586   : > { %2349 = vmatmul.mubr.msk.f32.vlgmr.msra.gmra.mrb[12].mxu0 %vm945_vm8, %v1978_v41 }
 0x58e   : > { %v1983_v54 = vpop.permute.xlu1 %1982 }
 0x592   : > { %v1037_v4 = vpop.permute.xlu1 %1036 }
 0x593   : > { %v1116_v19 = vadd.f32 %v3590_v36, %v1037_v4  ;;  %v1118_v10 = vadd.f32 %v3592_v37, %v1037_v4 }
 0x594   : > { %v2161_v63 = vpop.permute.xlu0 %2160 }
 0x595   : > { %v1120_v20 = vmax.f32 %v1116_v19, 0.0  ;;  %v1121_v35 = vmax.f32 %v1118_v10, 0.0 }
 0x596   : > { %v1807_v25 = vpop.permute.xlu1 %1806 }
 0x597   : > { %1122 = vst [vmem:[%s3631_s20] sm:$0xff] %v1120_v20  ;;  %1123 = vst [vmem:[%s3631_s20 + $0x8] sm:$0xff] %v1121_v35 }
 0x598   : > { %v1426_v40 = vpop.permute.xlu0 %1425 }
 0x599   : > { %v1504_v36 = vadd.f32 %v3594_v28, %v1426_v40  ;;  %v1506_v37 = vadd.f32 %v3596_v58, %v1426_v40 }
 0x59b   : > { %v1508_v16 = vmax.f32 %v1504_v36, 0.0  ;;  %v1509_v51 = vmax.f32 %v1506_v37, 0.0 }
 0x59c   : > { %v2172_v48 = vpop.permute.xlu0 %2171 }
 0x59d   : > { %2341 = vst [vmem:[%s3631_s20 + $0x10] sm:$0xff] %v1508_v16  ;;  %2342 = vst [vmem:[%s3631_s20 + $0x18] sm:$0xff] %v1509_v51 }
 0x645   : > { %v1884_v21 = vpop.f32.mrb[10].mxu0 }
 0x646   : > { %v1885_v52 = vadd.f32 %v1884_v21, %v1807_v25  ;;  %v1886_v33 = vpop.f32.mrb[11].mxu0 }
 0x647   : > { %v1887_v17 = vadd.f32 %v1886_v33, %v1807_v25 }
 0x648   : > { %v1889_v0 = vmax.f32 %v1885_v52, 0.0 }
 0x649   : > { %v1890_v45 = vmax.f32 %v1887_v17, 0.0 }
 0x64a   : > { %2347 = vst [vmem:[%s3631_s20 + $0x20] sm:$0xff] %v1889_v0 }
 0x64b   : > { %2348 = vst [vmem:[%s3631_s20 + $0x28] sm:$0xff] %v1890_v45 }
 0x659   : > { %v2150_v46 = vpop.f32.mrb[12].mxu0 }
 0x65a   : > { %v2151_v38 = vadd.f32 %v2150_v46, %v1983_v54  ;;  %v2152_v22 = vpop.f32.mrb[13].mxu0 }
 0x65b   : > { %v2153_v14 = vadd.f32 %v2152_v22, %v1983_v54 }
 0x65c   : > { %v2163_v28 = vmul.f32 %v2161_v63, %v2151_v38  ;;  %vm2155_vm1 = vcmp.gt.f32.partialorder %v2151_v38, 0.0 }
 0x65d   : > { %vm2156_vm6 = vcmp.gt.f32.partialorder %v2153_v14, 0.0  ;;  %v2164_v58 = vmul.f32 %v2161_v63, %v2153_v14 }
 0x65e   : > { %v2165_v12 = vsel %vm2155_vm1, %v2151_v38, %v2163_v28 }
 0x65f   : > { %v2166_v47 = vsel %vm2156_vm6, %v2153_v14, %v2164_v58 }
 0x660   : > { %2350 = vmatprep.subr.msk.mxu1 %vm556_vm4, %v2166_v47 }
 0x661   : > { %2351 = vmatpush1.msk.msra.mxu1 %vm556_vm4, %v2165_v12 }
 0x662   : > { %2352 = vmatmul.mubr.msk.f32.vlgmr.msra.gmra.mrb[8].mxu1 %vm1039_vm13, %v3507_v43 }
 0x735   : > { %v2249_v3 = vpop.f32.mrb[8].mxu1 }
 0x736   : > { %v2250_v30 = vadd.f32 %v2249_v3, %v2172_v48  ;;  %v2251_v8 = vpop.f32.mrb[9].mxu1 }
 0x737   : > { %v2252_v44 = vadd.f32 %v2251_v8, %v2172_v48 }
 0x738   : > { %v2254_v32 = vmax.f32 %v2250_v30, 0.0 }
 0x739   : > { %v2255_v62 = vmax.f32 %v2252_v44, 0.0 }
 0x73a   : > { %2353 = vst [vmem:[%s3631_s20 + $0x30] sm:$0xff] %v2254_v32 }
 0x73b   : > { %2354 = vst [vmem:[%s3631_s20 + $0x38] sm:$0xff] %v2255_v62 }
 0x73c PF: > { %s19_s30 = sadd.s32 1, %s2870_s30  }
 0x73d   : > { %p16_p4 = scmp.ge.s32.totalorder %s19_s30, 4  }
 0x73f   :  { %18 = sbr.rel (!%p16_p4) target bundleno = 1 (0x1), region = 89 }

</bundles_post_ra>
